<compile_context>
chip_gen: v7x
topology: tpu7x:2x2x1
jax: 0.10.0
libtpu: 0.0.40
codegen_flags: <defaults>
</compile_context>

<pallas_src>
import functools
import math

import jax
import jax.numpy as jnp
from jax.experimental import pallas as pl
from jax.experimental.pallas import tpu as pltpu

EPS = 1e-5


# ----------------------------------------------------------------------------
# Pallas kernel
# ----------------------------------------------------------------------------
def _axial_wopos_kernel(x_ref, w_ref, b_ref, o_ref, *, groups, gp, tb, seg_len,
                        compute_dtype):
    """One grid step: tb length-L segments of the flattened batch, all groups.

    x_ref: (C, tb*L)            activations (columns = segment*L + position)
    w_ref: (2*out_planes, C)    folded projection weight, rows = [q | k | v]
    b_ref: (2*out_planes, 1)    folded projection bias (float32)
    o_ref: (out_planes, tb*L)   output slab (lane-dense)
    """
    L = seg_len
    tbl = tb * L
    gph = gp // 2
    half = groups * gph                       # number of q rows (= out_planes // 2)

    # ---- fused qkv projection: one lane-dense MXU matmul, f32 accumulation ---
    qkv = jnp.dot(w_ref[...], x_ref[...],
                  preferred_element_type=jnp.float32) + b_ref[...]   # (2*out, tbl)

    # ---- split into per-group q / k / v slabs (contiguous row ranges) --------
    # Row layout is [all q | all k | all v]; per-group slices + leading-dim stack
    # avoid any reshape of the sublane/lane dims.
    q3 = jnp.stack([qkv[g * gph:(g + 1) * gph, :]
                    for g in range(groups)], axis=0)                  # (G, gph, tbl) f32
    k3 = jnp.stack([qkv[half + g * gph: half + (g + 1) * gph, :]
                    for g in range(groups)], axis=0).astype(compute_dtype)
    v3 = jnp.stack([qkv[2 * half + g * gp: 2 * half + (g + 1) * gp, :]
                    for g in range(groups)], axis=0).astype(compute_dtype)

    # ---- per-segment attention (each segment attends only within itself) -----
    svs = []
    for t in range(tb):
        c0 = t * L
        # Only q gets a (tiny, per-segment) transpose; k/v keep their natural
        # channel-major layout so both einsums are canonical batched matmuls.
        qt = jnp.swapaxes(q3[:, :, c0:c0 + L], 1, 2).astype(compute_dtype)  # (G, L, gph)
        k = k3[:, :, c0:c0 + L]                                             # (G, gph, L)
        v = v3[:, :, c0:c0 + L]                                             # (G, gp,  L)

        logits = jnp.einsum('gic,gcj->gij', qt, k,
                            preferred_element_type=jnp.float32)             # (G, L, L)

        # softmax along lanes; reciprocal on the EUP; everything in f32.
        m = jnp.max(logits, axis=-1, keepdims=True)
        e = jnp.exp(logits - m)
        p = e * pl.reciprocal(jnp.sum(e, axis=-1, keepdims=True), approx=True)

        # sv[g,c,i] = sum_j v[g,c,j] * p[g,i,j]  -- both operands contract their
        # minor axis (flash 'bqd,bkd->bqk' form); p is only (L, L) per group.
        sv = jnp.einsum('gcj,gij->gci', v, p.astype(compute_dtype),
                        preferred_element_type=jnp.float32)                  # (G, gp, L)
        svs.append(sv)

    # ---- lane-dense output store (bn_output already folded into v) -----------
    sv_all = svs[0] if tb == 1 else jnp.concatenate(svs, axis=-1)   # (G, gp, tbl) f32
    for g in range(groups):
        o_ref[g * gp:(g + 1) * gp, :] = sv_all[g].astype(o_ref.dtype)


# ----------------------------------------------------------------------------
# Tiling policy
# ----------------------------------------------------------------------------
def _pick_tb(batch, seg_len, *, max_lane=2048, max_unroll=32):
    """Segments per grid step.

    tb*L is kept a multiple of 128 (lane-dense, (8,128)-legal blocks). With
    per-segment scores there is no masked-compute penalty for tb > 1, so tb is
    only grown (mildly) to keep the grid short when the batch is very large.
    """
    quantum = 128 // math.gcd(seg_len, 128)
    tb = quantum
    while ((batch + tb - 1) // tb > 8
           and tb * 2 <= max_unroll
           and tb * 2 * seg_len <= max_lane):
        tb *= 2
    return tb


# ----------------------------------------------------------------------------
# Wrapper
# ----------------------------------------------------------------------------
def axial_attention_wopos(x, params, *, width=False, compute_dtype=jnp.bfloat16):
    """Forward of AxialAttention_wopos. x is NCHW: (N, C, H, W).

    compute_dtype controls the MXU operand precision (bf16 by default for
    v6e/v7x throughput); accumulation and the softmax stay float32.
    """
    N, C, H, W = x.shape
    groups = params["groups"]
    gp = params["gp"]
    out_planes = groups * gp
    w_eff = params["w_eff"]          # (2*out_planes, C), rows = [q | k | v]
    b_eff = params["b_eff"]          # (2*out_planes, 1), float32
    assert w_eff.shape == (2 * out_planes, C)

    # Same permute + flatten the PyTorch module performs, but channel-leading so
    # each grid step reads one lane-dense (C, tb*L) slab.
    if width:
        x2 = jnp.transpose(x, (1, 0, 2, 3))     # (C, N, H, W): attend along W
        batch, seg_len = N * H, W
    else:
        x2 = jnp.transpose(x, (1, 0, 3, 2))     # (C, N, W, H): attend along H
        batch, seg_len = N * W, H
    x2 = x2.reshape(C, batch * seg_len)

    tb = _pick_tb(batch, seg_len)
    n_steps = max(2, (batch + tb - 1) // tb)
    if n_steps % 2:
        n_steps += 1                             # even step count for 2-TC parts
    tbl = tb * seg_len
    padded_cols = n_steps * tbl
    if padded_cols != batch * seg_len:           # zero-pad instead of fragile fallbacks
        x2 = jnp.pad(x2, ((0, 0), (0, padded_cols - batch * seg_len)))

    # Pre-cast the MXU operands once in the wrapper (halves activation/weight
    # HBM traffic and removes per-step casts of the resident weight). The bias
    # stays f32: it is added to the f32 accumulator.
    x2 = x2.astype(compute_dtype)
    w_cd = w_eff.astype(compute_dtype)

    kern = functools.partial(_axial_wopos_kernel, groups=groups, gp=gp, tb=tb,
                             seg_len=seg_len, compute_dtype=compute_dtype)
    out = pl.pallas_call(
        kern,
        out_shape=jax.ShapeDtypeStruct((out_planes, padded_cols), x.dtype),
        grid=(n_steps,),
        in_specs=[
            pl.BlockSpec((C, tbl), lambda i: (0, i)),              # activations
            pl.BlockSpec((2 * out_planes, C), lambda i: (0, 0)),   # folded weight
            pl.BlockSpec((2 * out_planes, 1), lambda i: (0, 0)),   # folded bias
        ],
        out_specs=pl.BlockSpec((out_planes, tbl), lambda i: (0, i)),
        compiler_params=pltpu.CompilerParams(dimension_semantics=("parallel",)),
    )(x2, w_cd, b_eff)

    out = out[:, :batch * seg_len]
    if width:
        out = out.reshape(out_planes, N, H, W)
        out = jnp.transpose(out, (1, 0, 2, 3))   # (N, out_planes, H, W)
    else:
        out = out.reshape(out_planes, N, W, H)
        out = jnp.transpose(out, (1, 0, 3, 2))   # (N, out_planes, H, W)
    # TODO(synk): stride > 1 AvgPool2d path not implemented (module default stride=1).
    return out


# ----------------------------------------------------------------------------
# Parameter construction (deterministic, synthetic) + eval-mode BN folding
# ----------------------------------------------------------------------------
def make_axial_wopos_params(key, in_planes, out_planes, groups):
    gp = out_planes // groups
    gph = gp // 2
    ks = jax.random.split(key, 7)

    # qkv_transform: Conv1d(in_planes, 2*out_planes, k=1, bias=False), N(0, sqrt(1/in))
    w_qkv = jax.random.normal(ks[0], (2 * out_planes, in_planes)) * math.sqrt(1.0 / in_planes)
    # BatchNorm affine params (eval mode: running_mean=0, running_var=1)
    g_qkv = 1.0 + 0.1 * jax.random.normal(ks[1], (2 * out_planes,))
    b_qkv = 0.1 * jax.random.normal(ks[2], (2 * out_planes,))
    g_sim = 1.0 + 0.1 * jax.random.normal(ks[3], (groups,))
    b_sim = 0.1 * jax.random.normal(ks[4], (groups,))
    g_out = 1.0 + 0.1 * jax.random.normal(ks[5], (out_planes,))
    b_out = 0.1 * jax.random.normal(ks[6], (out_planes,))

    s_qkv = g_qkv / jnp.sqrt(1.0 + EPS)
    s_sim = g_sim / jnp.sqrt(1.0 + EPS)
    s_out = g_out / jnp.sqrt(1.0 + EPS)

    # Module channel layout: o = g*(2*gp) + c; c<gp/2 -> q, gp/2<=c<gp -> k, c>=gp -> v.
    mult = s_qkv.reshape(groups, 2 * gp)
    bias = b_qkv.reshape(groups, 2 * gp)
    # bn_similarity scale folded into q channels (its bias cancels in the softmax).
    mult = mult.at[:, :gph].multiply(s_sim[:, None])
    bias = bias.at[:, :gph].multiply(s_sim[:, None])
    # bn_output scale/bias folded into v channels (softmax rows sum to 1).
    so = s_out.reshape(groups, gp)
    bo = b_out.reshape(groups, gp)
    mult = mult.at[:, gp:].multiply(so)
    bias = bias.at[:, gp:].set(bias[:, gp:] * so + bo)

    w_folded = w_qkv * mult.reshape(2 * out_planes)[:, None]
    b_folded = bias.reshape(2 * out_planes)

    # Permute rows to [all q | all k | all v] (group-major within each section)
    # so the kernel's q/k/v slices are large contiguous row ranges.
    base = (2 * gp) * jnp.arange(groups)[:, None]
    perm_q = (base + jnp.arange(gph)[None, :]).reshape(-1)
    perm_k = (base + gph + jnp.arange(gph)[None, :]).reshape(-1)
    perm_v = (base + gp + jnp.arange(gp)[None, :]).reshape(-1)
    perm = jnp.concatenate([perm_q, perm_k, perm_v])

    w_eff = w_folded[perm].astype(jnp.float32)
    b_eff = b_folded[perm].reshape(2 * out_planes, 1).astype(jnp.float32)

    return dict(
        w_eff=w_eff, b_eff=b_eff, groups=groups, gp=gp,
        # raw (unfolded) parameters, used by the pure-JAX reference
        w_qkv=w_qkv, g_qkv=g_qkv, b_qkv=b_qkv, g_sim=g_sim, b_sim=b_sim,
        g_out=g_out, b_out=b_out,
    )


# ----------------------------------------------------------------------------
# Pure-JAX reference (mirrors the PyTorch module line by line, eval-mode BN)
# ----------------------------------------------------------------------------
def axial_attention_wopos_ref(x, params, *, width=False):
    groups, gp = params["groups"], params["gp"]
    out_planes = groups * gp
    gph = gp // 2
    if width:
        xp = jnp.transpose(x, (0, 2, 1, 3))     # (N, H, C, W)
    else:
        xp = jnp.transpose(x, (0, 3, 1, 2))     # (N, W, C, H)
    Nb, Wd, Cc, L = xp.shape
    xb = xp.reshape(Nb * Wd, Cc, L)

    s_qkv = params["g_qkv"] / jnp.sqrt(1.0 + EPS)
    qkv = jnp.einsum('oc,bcl->bol', params["w_qkv"], xb)
    qkv = qkv * s_qkv[None, :, None] + params["b_qkv"][None, :, None]
    qkv = qkv.reshape(Nb * Wd, groups, 2 * gp, L)
    q, k, v = qkv[:, :, :gph], qkv[:, :, gph:gp], qkv[:, :, gp:]

    qk = jnp.einsum('bgci,bgcj->bgij', q, k)
    s_sim = params["g_sim"] / jnp.sqrt(1.0 + EPS)
    sim = qk * s_sim[None, :, None, None] + params["b_sim"][None, :, None, None]
    sim = jax.nn.softmax(sim, axis=3)

    sv = jnp.einsum('bgij,bgcj->bgci', sim, v).reshape(Nb * Wd, out_planes, L)
    s_out = params["g_out"] / jnp.sqrt(1.0 + EPS)
    sv = sv * s_out[None, :, None] + params["b_out"][None, :, None]

    out = sv.reshape(Nb, Wd, out_planes, L)
    if width:
        out = jnp.transpose(out, (0, 2, 1, 3))
    else:
        out = jnp.transpose(out, (0, 2, 3, 1))
    return out


if __name__ == "__main__":
    N = 2
    in_planes = 16
    out_planes = 16
    groups = 2                 # group_planes gp = 8
    H = W = 16                 # attended axis length = 16

    key = jax.random.PRNGKey(0)
    kx, kp = jax.random.split(key)
    x = jax.random.normal(kx, (N, in_planes, H, W), dtype=jnp.float32)
    params = make_axial_wopos_params(kp, in_planes, out_planes, groups)

    for width in (False, True):
        ref = axial_attention_wopos_ref(x, params, width=width)

        # Exact-precision path (f32 MXU operands): tight check of semantics.
        out32 = jax.block_until_ready(
            axial_attention_wopos(x, params, width=width,
                                  compute_dtype=jnp.float32))
        assert out32.shape == (N, out_planes, H, W)
        err32 = float(jnp.max(jnp.abs(out32 - ref)))
        assert err32 < 5e-2, f"width={width}: f32 max abs err {err32}"

        # Default fast path (bf16 MXU operands, f32 accumulation/softmax):
        # loose tolerance appropriate for bf16 operand rounding.
        out16 = jax.block_until_ready(
            axial_attention_wopos(x, params, width=width))
        assert out16.shape == (N, out_planes, H, W)
        assert bool(jnp.all(jnp.isfinite(out16)))
        err16 = float(jnp.max(jnp.abs(out16 - ref)))
        assert err16 < 5e-1, f"width={width}: bf16 max abs err {err16}"

    print("KERNEL_OK")
</pallas_src>

<mosaic_0001>
module attributes {stable_mosaic.version = 11 : i64} {
  func.func @_axial_wopos_kernel(%arg0: i32, %arg1: memref<16x128xf32, #tpu.memory_space<vmem>>, %arg2: memref<32x16xf32, #tpu.memory_space<vmem>>, %arg3: memref<32x1xf32, #tpu.memory_space<vmem>>, %arg4: memref<16x128xf32, #tpu.memory_space<vmem>>) attributes {dimension_semantics = [#tpu.dimension_semantics<parallel>], iteration_bounds = array<i64: 4>, scalar_prefetch = 0 : i64, scratch_operands = 0 : i64, tpu.core_type = #tpu.core_type<tc>, window_params = [{transform_indices = @transform_0, window_bounds = array<i64: 16, 128>}, {pipeline_mode = #tpu.pipeline_mode<synchronous>, transform_indices = @transform_1, window_bounds = array<i64: 32, 16>}, {pipeline_mode = #tpu.pipeline_mode<synchronous>, transform_indices = @transform_2, window_bounds = array<i64: 32, 1>}, {transform_indices = @transform_3, window_bounds = array<i64: 16, 128>}]} {
    %c0 = arith.constant 0 : index
    %c0_0 = arith.constant 0 : index
    %0 = vector.load %arg2[%c0, %c0_0] : memref<32x16xf32, #tpu.memory_space<vmem>>, vector<32x16xf32>
    %c0_1 = arith.constant 0 : index
    %c0_2 = arith.constant 0 : index
    %1 = vector.load %arg1[%c0_1, %c0_2] : memref<16x128xf32, #tpu.memory_space<vmem>>, vector<16x128xf32>
    %cst = arith.constant dense<0.000000e+00> : vector<32x128xf32>
    %2 = tpu.matmul %0, %1, %cst {dimension_numbers = #tpu.dot_dimension_numbers<[1], [0], [0], [1], [0, 0, 1, 1], [], []>} : vector<32x16xf32>, vector<16x128xf32>, vector<32x128xf32> -> vector<32x128xf32>
    %c0_3 = arith.constant 0 : index
    %c0_4 = arith.constant 0 : index
    %3 = vector.load %arg3[%c0_3, %c0_4] : memref<32x1xf32, #tpu.memory_space<vmem>>, vector<32x1xf32>
    %4 = vector.broadcast %3 : vector<32x1xf32> to vector<32x128xf32>
    %5 = arith.addf %2, %4 : vector<32x128xf32>
    %6 = vector.extract_strided_slice %5 {offsets = [0, 0], sizes = [4, 128], strides = [1, 1]} : vector<32x128xf32> to vector<4x128xf32>
    %7 = vector.extract_strided_slice %5 {offsets = [4, 0], sizes = [4, 128], strides = [1, 1]} : vector<32x128xf32> to vector<4x128xf32>
    %8 = vector.shape_cast %6 : vector<4x128xf32> to vector<1x4x128xf32>
    %9 = vector.shape_cast %7 : vector<4x128xf32> to vector<1x4x128xf32>
    %10 = tpu.concatenate %8, %9 in 0 : vector<1x4x128xf32>, vector<1x4x128xf32> -> vector<2x4x128xf32>
    %11 = vector.extract_strided_slice %5 {offsets = [8, 0], sizes = [4, 128], strides = [1, 1]} : vector<32x128xf32> to vector<4x128xf32>
    %12 = vector.extract_strided_slice %5 {offsets = [12, 0], sizes = [4, 128], strides = [1, 1]} : vector<32x128xf32> to vector<4x128xf32>
    %13 = vector.shape_cast %11 : vector<4x128xf32> to vector<1x4x128xf32>
    %14 = vector.shape_cast %12 : vector<4x128xf32> to vector<1x4x128xf32>
    %15 = tpu.concatenate %13, %14 in 0 : vector<1x4x128xf32>, vector<1x4x128xf32> -> vector<2x4x128xf32>
    %16 = vector.extract_strided_slice %5 {offsets = [16, 0], sizes = [8, 128], strides = [1, 1]} : vector<32x128xf32> to vector<8x128xf32>
    %17 = vector.extract_strided_slice %5 {offsets = [24, 0], sizes = [8, 128], strides = [1, 1]} : vector<32x128xf32> to vector<8x128xf32>
    %18 = vector.shape_cast %16 : vector<8x128xf32> to vector<1x8x128xf32>
    %19 = vector.shape_cast %17 : vector<8x128xf32> to vector<1x8x128xf32>
    %20 = tpu.concatenate %18, %19 in 0 : vector<1x8x128xf32>, vector<1x8x128xf32> -> vector<2x8x128xf32>
    %21 = vector.extract_strided_slice %10 {offsets = [0, 0, 0], sizes = [2, 4, 16], strides = [1, 1, 1]} : vector<2x4x128xf32> to vector<2x4x16xf32>
    %22 = tpu.transpose %21, [0, 2, 1] : vector<2x4x16xf32> -> vector<2x16x4xf32>
    %23 = vector.extract_strided_slice %15 {offsets = [0, 0, 0], sizes = [2, 4, 16], strides = [1, 1, 1]} : vector<2x4x128xf32> to vector<2x4x16xf32>
    %24 = vector.extract_strided_slice %20 {offsets = [0, 0, 0], sizes = [2, 8, 16], strides = [1, 1, 1]} : vector<2x8x128xf32> to vector<2x8x16xf32>
    "tpu.trace_start"() <{level = 10 : i32, message = "gic,gcj->gij"}> : () -> ()
    %cst_5 = arith.constant dense<0.000000e+00> : vector<2x16x16xf32>
    %25 = tpu.matmul %22, %23, %cst_5 {dimension_numbers = #tpu.dot_dimension_numbers<[2], [1], [1], [2], [0, 0, 0, 1, 1, 2], [0], [0]>} : vector<2x16x4xf32>, vector<2x4x16xf32>, vector<2x16x16xf32> -> vector<2x16x16xf32>
    "tpu.trace_stop"() : () -> ()
    %cst_6 = arith.constant dense<0xFF800000> : vector<2x16xf32>
    %26 = vector.multi_reduction <maximumf>, %25, %cst_6 [2] : vector<2x16x16xf32> to vector<2x16xf32>
    %27 = vector.shape_cast %26 : vector<2x16xf32> to vector<2x16x1xf32>
    %28 = vector.broadcast %27 : vector<2x16x1xf32> to vector<2x16x16xf32>
    %29 = arith.subf %25, %28 : vector<2x16x16xf32>
    %30 = math.exp %29 : vector<2x16x16xf32>
    %cst_7 = arith.constant dense<0.000000e+00> : vector<2x16xf32>
    %31 = vector.multi_reduction <add>, %30, %cst_7 [2] : vector<2x16x16xf32> to vector<2x16xf32>
    %32 = vector.shape_cast %31 : vector<2x16xf32> to vector<2x16x1xf32>
    %33 = tpu.reciprocal %32 {approx = true} : vector<2x16x1xf32> -> vector<2x16x1xf32>
    %34 = vector.broadcast %33 : vector<2x16x1xf32> to vector<2x16x16xf32>
    %35 = arith.mulf %30, %34 : vector<2x16x16xf32>
    "tpu.trace_start"() <{level = 10 : i32, message = "gcj,gij->gci"}> : () -> ()
    %cst_8 = arith.constant dense<0.000000e+00> : vector<2x8x16xf32>
    %36 = tpu.matmul %24, %35, %cst_8 {dimension_numbers = #tpu.dot_dimension_numbers<[2], [2], [1], [1], [0, 0, 0, 1, 1, 1], [0], [0]>} : vector<2x8x16xf32>, vector<2x16x16xf32>, vector<2x8x16xf32> -> vector<2x8x16xf32>
    "tpu.trace_stop"() : () -> ()
    %37 = vector.extract_strided_slice %10 {offsets = [0, 0, 16], sizes = [2, 4, 16], strides = [1, 1, 1]} : vector<2x4x128xf32> to vector<2x4x16xf32>
    %38 = tpu.transpose %37, [0, 2, 1] : vector<2x4x16xf32> -> vector<2x16x4xf32>
    %39 = vector.extract_strided_slice %15 {offsets = [0, 0, 16], sizes = [2, 4, 16], strides = [1, 1, 1]} : vector<2x4x128xf32> to vector<2x4x16xf32>
    %40 = vector.extract_strided_slice %20 {offsets = [0, 0, 16], sizes = [2, 8, 16], strides = [1, 1, 1]} : vector<2x8x128xf32> to vector<2x8x16xf32>
    "tpu.trace_start"() <{level = 10 : i32, message = "gic,gcj->gij"}> : () -> ()
    %cst_9 = arith.constant dense<0.000000e+00> : vector<2x16x16xf32>
    %41 = tpu.matmul %38, %39, %cst_9 {dimension_numbers = #tpu.dot_dimension_numbers<[2], [1], [1], [2], [0, 0, 0, 1, 1, 2], [0], [0]>} : vector<2x16x4xf32>, vector<2x4x16xf32>, vector<2x16x16xf32> -> vector<2x16x16xf32>
    "tpu.trace_stop"() : () -> ()
    %cst_10 = arith.constant dense<0xFF800000> : vector<2x16xf32>
    %42 = vector.multi_reduction <maximumf>, %41, %cst_10 [2] : vector<2x16x16xf32> to vector<2x16xf32>
    %43 = vector.shape_cast %42 : vector<2x16xf32> to vector<2x16x1xf32>
    %44 = vector.broadcast %43 : vector<2x16x1xf32> to vector<2x16x16xf32>
    %45 = arith.subf %41, %44 : vector<2x16x16xf32>
    %46 = math.exp %45 : vector<2x16x16xf32>
    %cst_11 = arith.constant dense<0.000000e+00> : vector<2x16xf32>
    %47 = vector.multi_reduction <add>, %46, %cst_11 [2] : vector<2x16x16xf32> to vector<2x16xf32>
    %48 = vector.shape_cast %47 : vector<2x16xf32> to vector<2x16x1xf32>
    %49 = tpu.reciprocal %48 {approx = true} : vector<2x16x1xf32> -> vector<2x16x1xf32>
    %50 = vector.broadcast %49 : vector<2x16x1xf32> to vector<2x16x16xf32>
    %51 = arith.mulf %46, %50 : vector<2x16x16xf32>
    "tpu.trace_start"() <{level = 10 : i32, message = "gcj,gij->gci"}> : () -> ()
    %cst_12 = arith.constant dense<0.000000e+00> : vector<2x8x16xf32>
    %52 = tpu.matmul %40, %51, %cst_12 {dimension_numbers = #tpu.dot_dimension_numbers<[2], [2], [1], [1], [0, 0, 0, 1, 1, 1], [0], [0]>} : vector<2x8x16xf32>, vector<2x16x16xf32>, vector<2x8x16xf32> -> vector<2x8x16xf32>
    "tpu.trace_stop"() : () -> ()
    %53 = vector.extract_strided_slice %10 {offsets = [0, 0, 32], sizes = [2, 4, 16], strides = [1, 1, 1]} : vector<2x4x128xf32> to vector<2x4x16xf32>
    %54 = tpu.transpose %53, [0, 2, 1] : vector<2x4x16xf32> -> vector<2x16x4xf32>
    %55 = vector.extract_strided_slice %15 {offsets = [0, 0, 32], sizes = [2, 4, 16], strides = [1, 1, 1]} : vector<2x4x128xf32> to vector<2x4x16xf32>
    %56 = vector.extract_strided_slice %20 {offsets = [0, 0, 32], sizes = [2, 8, 16], strides = [1, 1, 1]} : vector<2x8x128xf32> to vector<2x8x16xf32>
    "tpu.trace_start"() <{level = 10 : i32, message = "gic,gcj->gij"}> : () -> ()
    %cst_13 = arith.constant dense<0.000000e+00> : vector<2x16x16xf32>
    %57 = tpu.matmul %54, %55, %cst_13 {dimension_numbers = #tpu.dot_dimension_numbers<[2], [1], [1], [2], [0, 0, 0, 1, 1, 2], [0], [0]>} : vector<2x16x4xf32>, vector<2x4x16xf32>, vector<2x16x16xf32> -> vector<2x16x16xf32>
    "tpu.trace_stop"() : () -> ()
    %cst_14 = arith.constant dense<0xFF800000> : vector<2x16xf32>
    %58 = vector.multi_reduction <maximumf>, %57, %cst_14 [2] : vector<2x16x16xf32> to vector<2x16xf32>
    %59 = vector.shape_cast %58 : vector<2x16xf32> to vector<2x16x1xf32>
    %60 = vector.broadcast %59 : vector<2x16x1xf32> to vector<2x16x16xf32>
    %61 = arith.subf %57, %60 : vector<2x16x16xf32>
    %62 = math.exp %61 : vector<2x16x16xf32>
    %cst_15 = arith.constant dense<0.000000e+00> : vector<2x16xf32>
    %63 = vector.multi_reduction <add>, %62, %cst_15 [2] : vector<2x16x16xf32> to vector<2x16xf32>
    %64 = vector.shape_cast %63 : vector<2x16xf32> to vector<2x16x1xf32>
    %65 = tpu.reciprocal %64 {approx = true} : vector<2x16x1xf32> -> vector<2x16x1xf32>
    %66 = vector.broadcast %65 : vector<2x16x1xf32> to vector<2x16x16xf32>
    %67 = arith.mulf %62, %66 : vector<2x16x16xf32>
    "tpu.trace_start"() <{level = 10 : i32, message = "gcj,gij->gci"}> : () -> ()
    %cst_16 = arith.constant dense<0.000000e+00> : vector<2x8x16xf32>
    %68 = tpu.matmul %56, %67, %cst_16 {dimension_numbers = #tpu.dot_dimension_numbers<[2], [2], [1], [1], [0, 0, 0, 1, 1, 1], [0], [0]>} : vector<2x8x16xf32>, vector<2x16x16xf32>, vector<2x8x16xf32> -> vector<2x8x16xf32>
    "tpu.trace_stop"() : () -> ()
    %69 = vector.extract_strided_slice %10 {offsets = [0, 0, 48], sizes = [2, 4, 16], strides = [1, 1, 1]} : vector<2x4x128xf32> to vector<2x4x16xf32>
    %70 = tpu.transpose %69, [0, 2, 1] : vector<2x4x16xf32> -> vector<2x16x4xf32>
    %71 = vector.extract_strided_slice %15 {offsets = [0, 0, 48], sizes = [2, 4, 16], strides = [1, 1, 1]} : vector<2x4x128xf32> to vector<2x4x16xf32>
    %72 = vector.extract_strided_slice %20 {offsets = [0, 0, 48], sizes = [2, 8, 16], strides = [1, 1, 1]} : vector<2x8x128xf32> to vector<2x8x16xf32>
    "tpu.trace_start"() <{level = 10 : i32, message = "gic,gcj->gij"}> : () -> ()
    %cst_17 = arith.constant dense<0.000000e+00> : vector<2x16x16xf32>
    %73 = tpu.matmul %70, %71, %cst_17 {dimension_numbers = #tpu.dot_dimension_numbers<[2], [1], [1], [2], [0, 0, 0, 1, 1, 2], [0], [0]>} : vector<2x16x4xf32>, vector<2x4x16xf32>, vector<2x16x16xf32> -> vector<2x16x16xf32>
    "tpu.trace_stop"() : () -> ()
    %cst_18 = arith.constant dense<0xFF800000> : vector<2x16xf32>
    %74 = vector.multi_reduction <maximumf>, %73, %cst_18 [2] : vector<2x16x16xf32> to vector<2x16xf32>
    %75 = vector.shape_cast %74 : vector<2x16xf32> to vector<2x16x1xf32>
    %76 = vector.broadcast %75 : vector<2x16x1xf32> to vector<2x16x16xf32>
    %77 = arith.subf %73, %76 : vector<2x16x16xf32>
    %78 = math.exp %77 : vector<2x16x16xf32>
    %cst_19 = arith.constant dense<0.000000e+00> : vector<2x16xf32>
    %79 = vector.multi_reduction <add>, %78, %cst_19 [2] : vector<2x16x16xf32> to vector<2x16xf32>
    %80 = vector.shape_cast %79 : vector<2x16xf32> to vector<2x16x1xf32>
    %81 = tpu.reciprocal %80 {approx = true} : vector<2x16x1xf32> -> vector<2x16x1xf32>
    %82 = vector.broadcast %81 : vector<2x16x1xf32> to vector<2x16x16xf32>
    %83 = arith.mulf %78, %82 : vector<2x16x16xf32>
    "tpu.trace_start"() <{level = 10 : i32, message = "gcj,gij->gci"}> : () -> ()
    %cst_20 = arith.constant dense<0.000000e+00> : vector<2x8x16xf32>
    %84 = tpu.matmul %72, %83, %cst_20 {dimension_numbers = #tpu.dot_dimension_numbers<[2], [2], [1], [1], [0, 0, 0, 1, 1, 1], [0], [0]>} : vector<2x8x16xf32>, vector<2x16x16xf32>, vector<2x8x16xf32> -> vector<2x8x16xf32>
    "tpu.trace_stop"() : () -> ()
    %85 = vector.extract_strided_slice %10 {offsets = [0, 0, 64], sizes = [2, 4, 16], strides = [1, 1, 1]} : vector<2x4x128xf32> to vector<2x4x16xf32>
    %86 = tpu.transpose %85, [0, 2, 1] : vector<2x4x16xf32> -> vector<2x16x4xf32>
    %87 = vector.extract_strided_slice %15 {offsets = [0, 0, 64], sizes = [2, 4, 16], strides = [1, 1, 1]} : vector<2x4x128xf32> to vector<2x4x16xf32>
    %88 = vector.extract_strided_slice %20 {offsets = [0, 0, 64], sizes = [2, 8, 16], strides = [1, 1, 1]} : vector<2x8x128xf32> to vector<2x8x16xf32>
    "tpu.trace_start"() <{level = 10 : i32, message = "gic,gcj->gij"}> : () -> ()
    %cst_21 = arith.constant dense<0.000000e+00> : vector<2x16x16xf32>
    %89 = tpu.matmul %86, %87, %cst_21 {dimension_numbers = #tpu.dot_dimension_numbers<[2], [1], [1], [2], [0, 0, 0, 1, 1, 2], [0], [0]>} : vector<2x16x4xf32>, vector<2x4x16xf32>, vector<2x16x16xf32> -> vector<2x16x16xf32>
    "tpu.trace_stop"() : () -> ()
    %cst_22 = arith.constant dense<0xFF800000> : vector<2x16xf32>
    %90 = vector.multi_reduction <maximumf>, %89, %cst_22 [2] : vector<2x16x16xf32> to vector<2x16xf32>
    %91 = vector.shape_cast %90 : vector<2x16xf32> to vector<2x16x1xf32>
    %92 = vector.broadcast %91 : vector<2x16x1xf32> to vector<2x16x16xf32>
    %93 = arith.subf %89, %92 : vector<2x16x16xf32>
    %94 = math.exp %93 : vector<2x16x16xf32>
    %cst_23 = arith.constant dense<0.000000e+00> : vector<2x16xf32>
    %95 = vector.multi_reduction <add>, %94, %cst_23 [2] : vector<2x16x16xf32> to vector<2x16xf32>
    %96 = vector.shape_cast %95 : vector<2x16xf32> to vector<2x16x1xf32>
    %97 = tpu.reciprocal %96 {approx = true} : vector<2x16x1xf32> -> vector<2x16x1xf32>
    %98 = vector.broadcast %97 : vector<2x16x1xf32> to vector<2x16x16xf32>
    %99 = arith.mulf %94, %98 : vector<2x16x16xf32>
    "tpu.trace_start"() <{level = 10 : i32, message = "gcj,gij->gci"}> : () -> ()
    %cst_24 = arith.constant dense<0.000000e+00> : vector<2x8x16xf32>
    %100 = tpu.matmul %88, %99, %cst_24 {dimension_numbers = #tpu.dot_dimension_numbers<[2], [2], [1], [1], [0, 0, 0, 1, 1, 1], [0], [0]>} : vector<2x8x16xf32>, vector<2x16x16xf32>, vector<2x8x16xf32> -> vector<2x8x16xf32>
    "tpu.trace_stop"() : () -> ()
    %101 = vector.extract_strided_slice %10 {offsets = [0, 0, 80], sizes = [2, 4, 16], strides = [1, 1, 1]} : vector<2x4x128xf32> to vector<2x4x16xf32>
    %102 = tpu.transpose %101, [0, 2, 1] : vector<2x4x16xf32> -> vector<2x16x4xf32>
    %103 = vector.extract_strided_slice %15 {offsets = [0, 0, 80], sizes = [2, 4, 16], strides = [1, 1, 1]} : vector<2x4x128xf32> to vector<2x4x16xf32>
    %104 = vector.extract_strided_slice %20 {offsets = [0, 0, 80], sizes = [2, 8, 16], strides = [1, 1, 1]} : vector<2x8x128xf32> to vector<2x8x16xf32>
    "tpu.trace_start"() <{level = 10 : i32, message = "gic,gcj->gij"}> : () -> ()
    %cst_25 = arith.constant dense<0.000000e+00> : vector<2x16x16xf32>
    %105 = tpu.matmul %102, %103, %cst_25 {dimension_numbers = #tpu.dot_dimension_numbers<[2], [1], [1], [2], [0, 0, 0, 1, 1, 2], [0], [0]>} : vector<2x16x4xf32>, vector<2x4x16xf32>, vector<2x16x16xf32> -> vector<2x16x16xf32>
    "tpu.trace_stop"() : () -> ()
    %cst_26 = arith.constant dense<0xFF800000> : vector<2x16xf32>
    %106 = vector.multi_reduction <maximumf>, %105, %cst_26 [2] : vector<2x16x16xf32> to vector<2x16xf32>
    %107 = vector.shape_cast %106 : vector<2x16xf32> to vector<2x16x1xf32>
    %108 = vector.broadcast %107 : vector<2x16x1xf32> to vector<2x16x16xf32>
    %109 = arith.subf %105, %108 : vector<2x16x16xf32>
    %110 = math.exp %109 : vector<2x16x16xf32>
    %cst_27 = arith.constant dense<0.000000e+00> : vector<2x16xf32>
    %111 = vector.multi_reduction <add>, %110, %cst_27 [2] : vector<2x16x16xf32> to vector<2x16xf32>
    %112 = vector.shape_cast %111 : vector<2x16xf32> to vector<2x16x1xf32>
    %113 = tpu.reciprocal %112 {approx = true} : vector<2x16x1xf32> -> vector<2x16x1xf32>
    %114 = vector.broadcast %113 : vector<2x16x1xf32> to vector<2x16x16xf32>
    %115 = arith.mulf %110, %114 : vector<2x16x16xf32>
    "tpu.trace_start"() <{level = 10 : i32, message = "gcj,gij->gci"}> : () -> ()
    %cst_28 = arith.constant dense<0.000000e+00> : vector<2x8x16xf32>
    %116 = tpu.matmul %104, %115, %cst_28 {dimension_numbers = #tpu.dot_dimension_numbers<[2], [2], [1], [1], [0, 0, 0, 1, 1, 1], [0], [0]>} : vector<2x8x16xf32>, vector<2x16x16xf32>, vector<2x8x16xf32> -> vector<2x8x16xf32>
    "tpu.trace_stop"() : () -> ()
    %117 = vector.extract_strided_slice %10 {offsets = [0, 0, 96], sizes = [2, 4, 16], strides = [1, 1, 1]} : vector<2x4x128xf32> to vector<2x4x16xf32>
    %118 = tpu.transpose %117, [0, 2, 1] : vector<2x4x16xf32> -> vector<2x16x4xf32>
    %119 = vector.extract_strided_slice %15 {offsets = [0, 0, 96], sizes = [2, 4, 16], strides = [1, 1, 1]} : vector<2x4x128xf32> to vector<2x4x16xf32>
    %120 = vector.extract_strided_slice %20 {offsets = [0, 0, 96], sizes = [2, 8, 16], strides = [1, 1, 1]} : vector<2x8x128xf32> to vector<2x8x16xf32>
    "tpu.trace_start"() <{level = 10 : i32, message = "gic,gcj->gij"}> : () -> ()
    %cst_29 = arith.constant dense<0.000000e+00> : vector<2x16x16xf32>
    %121 = tpu.matmul %118, %119, %cst_29 {dimension_numbers = #tpu.dot_dimension_numbers<[2], [1], [1], [2], [0, 0, 0, 1, 1, 2], [0], [0]>} : vector<2x16x4xf32>, vector<2x4x16xf32>, vector<2x16x16xf32> -> vector<2x16x16xf32>
    "tpu.trace_stop"() : () -> ()
    %cst_30 = arith.constant dense<0xFF800000> : vector<2x16xf32>
    %122 = vector.multi_reduction <maximumf>, %121, %cst_30 [2] : vector<2x16x16xf32> to vector<2x16xf32>
    %123 = vector.shape_cast %122 : vector<2x16xf32> to vector<2x16x1xf32>
    %124 = vector.broadcast %123 : vector<2x16x1xf32> to vector<2x16x16xf32>
    %125 = arith.subf %121, %124 : vector<2x16x16xf32>
    %126 = math.exp %125 : vector<2x16x16xf32>
    %cst_31 = arith.constant dense<0.000000e+00> : vector<2x16xf32>
    %127 = vector.multi_reduction <add>, %126, %cst_31 [2] : vector<2x16x16xf32> to vector<2x16xf32>
    %128 = vector.shape_cast %127 : vector<2x16xf32> to vector<2x16x1xf32>
    %129 = tpu.reciprocal %128 {approx = true} : vector<2x16x1xf32> -> vector<2x16x1xf32>
    %130 = vector.broadcast %129 : vector<2x16x1xf32> to vector<2x16x16xf32>
    %131 = arith.mulf %126, %130 : vector<2x16x16xf32>
    "tpu.trace_start"() <{level = 10 : i32, message = "gcj,gij->gci"}> : () -> ()
    %cst_32 = arith.constant dense<0.000000e+00> : vector<2x8x16xf32>
    %132 = tpu.matmul %120, %131, %cst_32 {dimension_numbers = #tpu.dot_dimension_numbers<[2], [2], [1], [1], [0, 0, 0, 1, 1, 1], [0], [0]>} : vector<2x8x16xf32>, vector<2x16x16xf32>, vector<2x8x16xf32> -> vector<2x8x16xf32>
    "tpu.trace_stop"() : () -> ()
    %133 = vector.extract_strided_slice %10 {offsets = [0, 0, 112], sizes = [2, 4, 16], strides = [1, 1, 1]} : vector<2x4x128xf32> to vector<2x4x16xf32>
    %134 = tpu.transpose %133, [0, 2, 1] : vector<2x4x16xf32> -> vector<2x16x4xf32>
    %135 = vector.extract_strided_slice %15 {offsets = [0, 0, 112], sizes = [2, 4, 16], strides = [1, 1, 1]} : vector<2x4x128xf32> to vector<2x4x16xf32>
    %136 = vector.extract_strided_slice %20 {offsets = [0, 0, 112], sizes = [2, 8, 16], strides = [1, 1, 1]} : vector<2x8x128xf32> to vector<2x8x16xf32>
    "tpu.trace_start"() <{level = 10 : i32, message = "gic,gcj->gij"}> : () -> ()
    %cst_33 = arith.constant dense<0.000000e+00> : vector<2x16x16xf32>
    %137 = tpu.matmul %134, %135, %cst_33 {dimension_numbers = #tpu.dot_dimension_numbers<[2], [1], [1], [2], [0, 0, 0, 1, 1, 2], [0], [0]>} : vector<2x16x4xf32>, vector<2x4x16xf32>, vector<2x16x16xf32> -> vector<2x16x16xf32>
    "tpu.trace_stop"() : () -> ()
    %cst_34 = arith.constant dense<0xFF800000> : vector<2x16xf32>
    %138 = vector.multi_reduction <maximumf>, %137, %cst_34 [2] : vector<2x16x16xf32> to vector<2x16xf32>
    %139 = vector.shape_cast %138 : vector<2x16xf32> to vector<2x16x1xf32>
    %140 = vector.broadcast %139 : vector<2x16x1xf32> to vector<2x16x16xf32>
    %141 = arith.subf %137, %140 : vector<2x16x16xf32>
    %142 = math.exp %141 : vector<2x16x16xf32>
    %cst_35 = arith.constant dense<0.000000e+00> : vector<2x16xf32>
    %143 = vector.multi_reduction <add>, %142, %cst_35 [2] : vector<2x16x16xf32> to vector<2x16xf32>
    %144 = vector.shape_cast %143 : vector<2x16xf32> to vector<2x16x1xf32>
    %145 = tpu.reciprocal %144 {approx = true} : vector<2x16x1xf32> -> vector<2x16x1xf32>
    %146 = vector.broadcast %145 : vector<2x16x1xf32> to vector<2x16x16xf32>
    %147 = arith.mulf %142, %146 : vector<2x16x16xf32>
    "tpu.trace_start"() <{level = 10 : i32, message = "gcj,gij->gci"}> : () -> ()
    %cst_36 = arith.constant dense<0.000000e+00> : vector<2x8x16xf32>
    %148 = tpu.matmul %136, %147, %cst_36 {dimension_numbers = #tpu.dot_dimension_numbers<[2], [2], [1], [1], [0, 0, 0, 1, 1, 1], [0], [0]>} : vector<2x8x16xf32>, vector<2x16x16xf32>, vector<2x8x16xf32> -> vector<2x8x16xf32>
    "tpu.trace_stop"() : () -> ()
    %149 = tpu.concatenate %36, %52, %68, %84, %100, %116, %132, %148 in 2 : vector<2x8x16xf32>, vector<2x8x16xf32>, vector<2x8x16xf32>, vector<2x8x16xf32>, vector<2x8x16xf32>, vector<2x8x16xf32>, vector<2x8x16xf32>, vector<2x8x16xf32> -> vector<2x8x128xf32>
    %150 = vector.extract_strided_slice %149 {offsets = [0, 0, 0], sizes = [1, 8, 128], strides = [1, 1, 1]} : vector<2x8x128xf32> to vector<1x8x128xf32>
    %151 = vector.shape_cast %150 : vector<1x8x128xf32> to vector<8x128xf32>
    %c0_37 = arith.constant 0 : index
    %c0_38 = arith.constant 0 : index
    %152 = vector.load %arg4[%c0_37, %c0_38] : memref<16x128xf32, #tpu.memory_space<vmem>>, vector<8x128xf32>
    tpu.vector_store %arg4[%c0_37, %c0_38], %151 {strides = array<i32>} : memref<16x128xf32, #tpu.memory_space<vmem>>, vector<8x128xf32>,
    %153 = vector.extract_strided_slice %149 {offsets = [1, 0, 0], sizes = [1, 8, 128], strides = [1, 1, 1]} : vector<2x8x128xf32> to vector<1x8x128xf32>
    %154 = vector.shape_cast %153 : vector<1x8x128xf32> to vector<8x128xf32>
    %c8 = arith.constant 8 : index
    %c0_39 = arith.constant 0 : index
    %155 = vector.load %arg4[%c8, %c0_39] : memref<16x128xf32, #tpu.memory_space<vmem>>, vector<8x128xf32>
    tpu.vector_store %arg4[%c8, %c0_39], %154 {strides = array<i32>} : memref<16x128xf32, #tpu.memory_space<vmem>>, vector<8x128xf32>,
    return
  }
  func.func @transform_0(%arg0: i32) -> (i32, i32) {
    %c0_i32 = arith.constant 0 : i32
    %c0_i32_0 = arith.constant 0 : i32
    return %c0_i32, %arg0 : i32, i32
  }
  func.func @transform_1(%arg0: i32) -> (i32, i32) {
    %c0_i32 = arith.constant 0 : i32
    %c0_i32_0 = arith.constant 0 : i32
    %c0_i32_1 = arith.constant 0 : i32
    return %c0_i32, %c0_i32_0 : i32, i32
  }
  func.func @transform_2(%arg0: i32) -> (i32, i32) {
    %c0_i32 = arith.constant 0 : i32
    %c0_i32_0 = arith.constant 0 : i32
    %c0_i32_1 = arith.constant 0 : i32
    return %c0_i32, %c0_i32_0 : i32, i32
  }
  func.func @transform_3(%arg0: i32) -> (i32, i32) {
    %c0_i32 = arith.constant 0 : i32
    %c0_i32_0 = arith.constant 0 : i32
    return %c0_i32, %arg0 : i32, i32
  }
}

</mosaic_0001>

<bundles_post_ra>
// kernel: tpu_custom_call.1
= control target key start
LH: loop header
LB: loop body
LE: loop exit
PB: predicated region body
PF: predicated region fallthrough
CT: control target
= control target key end

     0   :  { %8 = vsyncpa [#allocation4], 0  ;;  %s5354_s0 = inlined_call_operand.vmem [shape: f32[16,512], index: 0, kind: input, shape index: {}]   ;;  %s5355_s1 = inlined_call_operand.vmem [shape: f32[32,16], index: 1, kind: input, shape index: {}]   ;;  %s5356_s2 = inlined_call_operand.vmem [shape: f32[32,1], index: 2, kind: input, shape index: {}]   ;;  %s5357_s3 = inlined_call_operand.hbm [shape: f32[16,512], index: 3, kind: output, shape index: {}]  }
   0x1   :  { %10 = vsyncpa [#allocation4 + $0x1], 0  ;;  %s4807_s12 = smov 0   ;;  %s4809_s13 = smov 0  }
   0x2   :  { %s4811_s14 = smov 0   ;;  %s4813_s15 = smov 0  }
   0x3 LB: > { %s4040_s16 = sadd.s32 4294967295, %s4770_s15   ;;  %s4041_s17 = sadd.s32 4294967294, %s4770_s15   ;;  %s4770_s15 = sphi %s4813_s15, %s5365_s15   ;;  %s4766_s14 = sphi %s4811_s14, %s5364_s14   ;;  %s4762_s13 = sphi %s4809_s13, %s5363_s13   ;;  %s4758_s12 = sphi %s4807_s12, %s5362_s12  }
   0x4   : > { %s4830_s18 = sadd.s32 1, %s4770_s15   ;;  %s23_s19 = sadd.s32 1, %s4766_s14 }
   0x5   : > { %s20_s20 = ssub.s32 %s4770_s15, %s4830_s18  ;;  %p30_p0 = scmp.ne.s32.totalorder %s4766_s14, %s4762_s13 }
   0x6   : > { %p21_p1 = scmp.eq.s32.totalorder %s20_s20, 0  ;;  %p31_p2 = scmp.eq.s32.totalorder %s4770_s15, 0 }
   0x7   : > { %p102_p3 = scmp.eq.s32.totalorder %s4040_s16, 3  ;;  %p107_p4 = scmp.ne.s32.totalorder %s4762_s13, %s4758_s12 }
   0x8   : > { %s4843_s21 = scalar_select %p21_p1, %s4766_s14, %s23_s19  }
   0x9   : > { %p32_p5 = por %p31_p2, %p30_p0  ;;  %p4845_p6 = por %p102_p3, %p30_p0 }
   0xa   : > { %p108_p7 = scmp.eq.s32.totalorder %s4041_s17, 3  ;;  %p4043_p9 = scmp.ge.s32.totalorder %s4770_s15, 4 }
   0xc   : > { %p4849_p8 = por %p108_p7, %p107_p4  ;;  %130 = sbr.rel (%p4043_p9) target bundleno = 26 (0x1a), region = 24 }
  0x13   : > { %133 = sbr.rel (!%p32_p5) target bundleno = 26 (0x1a), region = 28  ;;  %s135_s24 = sand.u32 (%p32_p5), 1, %s4766_s14  }
  0x14   : > { %s4045_s25 = sshll.u32 (%p32_p5), %s4770_s15, 3  ;;  %s4044_s26 = sshll.u32 (%p32_p5), %s135_s24, 4 }
  0x15   : > { %s139_s29 = scalar_lea.vmem (%p32_p5), %s5354_s0, %s4045_s25  ;;  %s137_s30 = scalar_lea.vmem (%p32_p5), [#allocation2], %s4044_s26 }
  0x16   : > { %v169_v0 = vld [vmem:[%s139_s29] sm:$0xff] (%p32_p5) }
  0x17   : > { %v171_v1 = vld [vmem:[%s139_s29 + $0x20] sm:$0xff] (%p32_p5)  ;;  %170 = vst [vmem:[%s137_s30] sm:$0xff] (%p32_p5), %v169_v0 }
  0x18   : > { %172 = vst [vmem:[%s137_s30 + $0x8] sm:$0xff] (%p32_p5), %v171_v1 }
  0x1a PF: > { %p4046_p10 = scmp.ge.s32.totalorder %s4770_s15, 1  ;;  %p177_p11 = scmp.lt.s32.totalorder %s4770_s15, 5 }
  0x1c   : > { %p178_p12 = pnand %p4046_p10, %p177_p11 }
  0x1d   : > { %s184_s4 = sand.u32 (!%p178_p12), 1, %s4762_s13   ;;  %v207_v2 = vld [vmem:[%s5355_s1] sm:$0xff] (!%p178_p12)  ;;  %vm237_vm0 = vcmask (!%p178_p12), 130048   ;;  %v4772_v4 = vmov (!%p178_p12), 0   ;;  %v214_v7 = vld [vmem:[%s5356_s2 + $0x8] sm:$0xff] (!%p178_p12)  ;;  %vm411_vm1 = vcmask (!%p178_p12), 1043456  }
  0x1e   : > { %181 = sbr.rel (%p178_p12) target bundleno = 5234 (0x1472), region = 66  ;;  %v213_v3 = vld [vmem:[%s5356_s2] sm:$0xff] (!%p178_p12)  ;;  %s4870_s9 = sshll.u32 (!%p178_p12), %s184_s4, 4  ;;  %4259 = vmatprep.mubr.msk.f32.mxu0 (!%p178_p12), %vm237_vm0, %v207_v2  ;;  %4578 = vset.pattern.permute.xlu0 (!%p178_p12), %v4772_v4  ;;  %v208_v9 = vld [vmem:[%s5355_s1 + $0x8] sm:$0xff] (!%p178_p12)  ;;  %vm404_vm2 = vcmask (!%p178_p12), 31744   ;;  %v209_v22 = vld [vmem:[%s5355_s1 + $0x10] sm:$0xff] (!%p178_p12) }
  0x1f   : > { %219 = vperm.xlu0 (!%p178_p12), %4578, %v213_v3   ;;  %s186_s10 = scalar_lea.vmem (!%p178_p12), [#allocation2], %s4870_s9  ;;  %v210_v23 = vld [vmem:[%s5355_s1 + $0x18] sm:$0xff] (!%p178_p12)  ;;  %s4773_s28 = smov (!%p178_p12), 112   ;;  %v215_v32 = vld [vmem:[%s5356_s2 + $0x10] sm:$0xff] (!%p178_p12)  ;;  %v4774_v56 = vmov (!%p178_p12), 0.0|0.0   ;;  %vm4775_vm3 = vmmov (!%p178_p12), 0   ;;  %vm4947_vm4 = vmpackc.low (!%p178_p12), %vm237_vm0, %vm237_vm0 }
  0x20   : > { %v211_v5 = vld [vmem:[%s186_s10] sm:$0xff] (!%p178_p12)  ;;  %v212_v6 = vld [vmem:[%s186_s10 + $0x8] sm:$0xff] (!%p178_p12)  ;;  %v4776_v57 = vmov (!%p178_p12), 0.0   ;;  %s4777_s7 = smov (!%p178_p12), 96   ;;  %s4778_s8 = smov (!%p178_p12), 80   ;;  %vm3940_vm5 = vcmask (!%p178_p12), 261120  }
  0x21   : > { %v4457_v8 = vpack.c.bf16 (!%p178_p12), %v212_v6, %v211_v5  ;;  %v216_v33 = vld [vmem:[%s5356_s2 + $0x18] sm:$0xff] (!%p178_p12)  ;;  %s4779_s10 = smov (!%p178_p12), 64   ;;  %s4780_s11 = smov (!%p178_p12), 48   ;;  %vm3943_vm6 = vcmask (!%p178_p12), 392192   ;;  %vm3946_vm7 = vcmask (!%p178_p12), 523264   ;;  %vm3949_vm8 = vcmask (!%p178_p12), 654336  }
  0x22   : > { %s4781_s17 = smov (!%p178_p12), 32   ;;  %s4782_s19 = smov (!%p178_p12), 16   ;;  %vm3952_vm9 = vcmask (!%p178_p12), 785408   ;;  %vm3955_vm10 = vcmask (!%p178_p12), 916480  }
  0x23   : > { %4458 = vmatprep.subr.bf16.mxu0 (!%p178_p12), %v4457_v8  ;;  %224 = vperm.xlu0 (!%p178_p12), %4578, %v214_v7   ;;  %s206_s20 = scalar_lea.vmem (!%p178_p12), [#allocation3], %s4870_s9  ;;  %s4150_s25 = sshll.u32 (!%p178_p12), %s4040_s16, 7 }
  0x24   : > { %4460 = vmatpush3.bf16.msra.mxu0 (!%p178_p12), %v4457_v8  ;;  %s3973_s24 = sshll.u32 (!%p178_p12), %s206_s20, 4  ;;  %s5307_s27 = scalar_lea.hbm (!%p178_p12), %s5357_s3, %s4150_s25  ;;  %s5301_s24 = int_to_ptr.vmem [resolvable:$true] %s3973_s24 }
  0x25   : > { %4461 = vmatprep.subr.bf16.mxu0 %v4774_v56  ;;  %s5313_s16 = scalar_lea.sflag [#allocation4], %s184_s4  ;;  %s4783_s29 = smov [#allocation3]  }
  0x26   : > { %s4712_s30 = sshll.u32 %s4783_s29, 4  ;;  %s4713_s30 = int_to_ptr.vmem [resolvable:$false] %s4712_s30 }
  0x27   : > { %4260 = vmatmul.mubr.msk.f32.vlgmr.msra.gmra.mrb[0].mxu0 %vm237_vm0, %v208_v9  ;;  %s4714_s5 = scalar_lea.vmem %s4713_s30, 512  ;;  %p4715_p2 = scmp.lt.s32.totalorder %s5301_s24, %s4713_s30 }
  0x28   : > { %4262 = vmatprep.mubr.msk.f32.mxu0 %vm237_vm0, %v209_v22 }
  0x2b   : > { %4263 = vmatmul.mubr.msk.f32.gmra.mrb[2].mxu0 %vm237_vm0, %v210_v23 }
  0x2c   : > { %4279 = vmatprep.mubr.msk.f32.mxu0 %vm4775_vm3, %v4776_v57 }
  0x9e   : > { %v220_v10 = vpop.permute.xlu0 %219 }
  0xa2   : > { %v225_v11 = vpop.permute.xlu0 %224 }
  0xfa   : > { %v4261_v12 = vpop.f32.mrb[0].mxu0 }
  0xfb   : > { %v4881_v13 = vadd.f32 %v4261_v12, %v225_v11  ;;  %v316_v14 = vpop.f32.mrb[1].mxu0 }
  0xfc   : > { %v4883_v15 = vadd.f32 %v316_v14, %v220_v10 }
  0xfd   : > { %4265 = vmatprep.subr.msk.mxu1 %vm411_vm1, %v4881_v13  ;;  %v4888_v16 = vrot.slane %v4881_v13, 4 }
  0xfe   : > { %4266 = vmatpush3.msk.msra.mxu1 %vm411_vm1, %v4881_v13  ;;  %340 = vxpose.xlu1.b32.start.end [1/1] (short) (narrow) %v4883_v15, 16  ;;  %v4896_v17 = vrot.slane %v4883_v15, 4  ;;  %v4927_v34 = vpop.f32.mrb[2].mxu0 }
  0xff   : > { %4270 = vmatprep.subr.msk.mxu1 %vm411_vm1, %v4888_v16  ;;  %v4929_v35 = vpop.f32.mrb[3].mxu0 }
 0x103   : > { %372 = vxpose.xlu1.b32.start.end [1/1] (short) (narrow) %v4896_v17, 16 }
 0x121   : > { %4579 = vset.pattern.permute.xlu1 %v4772_v4 }
 0x17e   : > { %v356_v18 = vpop.trf.xlu1 }
 0x17f   : > { %4267 = vmatprep.mubr.msk.f32.mxu1 %vm404_vm2, %v356_v18 }
 0x182   : > { %v357_v19 = vpop.trf.xlu1 }
 0x183   : > { %4268 = vmatmul.mubr.msk.f32.vlgmr.msra.gmra.mrb[0].mxu1 %vm404_vm2, %v357_v19 }
 0x184   : > { %4271 = vmatpush3.msk.msra.mxu1 %vm411_vm1, %v4888_v16 }
 0x185   : > { %4465 = vmatprep.subr.bf16.mxu1 %v4774_v56 }
 0x186   : > { %v388_v20 = vpop.trf.xlu1 }
 0x187   : > { %4272 = vmatprep.mubr.msk.f32.mxu1 %vm404_vm2, %v388_v20 }
 0x18a   : > { %v389_v21 = vpop.trf.xlu1 }
 0x18b   : > { %4273 = vmatmul.mubr.msk.f32.vlgmr.msra.gmra.mrb[2].mxu1 %vm404_vm2, %v389_v21 }
 0x18c   : > { %4286 = vmatprep.mubr.msk.f32.mxu1 %vm4775_vm3, %v4776_v57 }
 0x256   : > { %v4269_v24 = vpop.f32.mrb[0].mxu1 }
 0x257   : > { %v480_v25 = vpop.f32.mrb[1].mxu1  ;;  %v575_v26 = vsel %vm237_vm0, %v4269_v24, -inf }
 0x258   : > { %576 = vmax.xlane.f32.xlu1 %v575_v26  ;;  %v572_v27 = vsel %vm237_vm0, %v480_v25, -inf }
 0x259   : > { %573 = vmax.xlane.f32.xlu0 %v572_v27 }
 0x25e   : > { %v4274_v28 = vpop.f32.mrb[2].mxu1 }
 0x25f   : > { %v563_v29 = vpop.f32.mrb[3].mxu1  ;;  %v581_v31 = vsel %vm237_vm0, %v4274_v28, -inf }
 0x260   : > { %v578_v30 = vsel %vm237_vm0, %v563_v29, -inf }
 0x261   : > { %579 = vmax.xlane.f32.xlu0 %v578_v30 }
 0x265   : > { %582 = vmax.xlane.f32.xlu0 %v581_v31 }
 0x269   : > { %774 = vrot.lane.b32.xlu1 %v4883_v15, %s4773_s28 }
 0x26d   : > { %229 = vperm.xlu1 %4579, %v215_v32  }
 0x271   : > { %234 = vperm.xlu1 %4579, %v216_v33  }
 0x27b   : > { %776 = vrot.lane.b32.xlu0 %v4896_v17, %s4773_s28 }
 0x2e5   : > { %v577_v36 = vpop.xlane.xlu1 %576 }
 0x2e6   : > { %v585_v37 = vsub.f32 %v4269_v24, %v577_v36  ;;  %v574_v38 = vpop.xlane.xlu0 %573 }
 0x2e7   : > { %v584_v39 = vsub.f32 %v480_v25, %v574_v38 }
 0x2e8   : > { %v590_v40 = vmul.f32 1.442695, %v585_v37 }
 0x2e9   : > { %v588_v41 = vmul.f32 1.442695, %v584_v39  ;;  %v775_v58 = vpop.permute.xlu1 %774 }
 0x2ea   : > { %4580 = vpow2.f32 %v590_v40 }
 0x2eb   : > { %4582 = vpow2.f32 %v588_v41 }
 0x2ed   : > { %v230_v60 = vpop.permute.xlu1 %229 }
 0x2ee   : > { %v580_v42 = vpop.xlane.xlu0 %579  ;;  %v4955_v11 = vadd.f32 %v4929_v35, %v230_v60 }
 0x2ef   : > { %v586_v43 = vsub.f32 %v563_v29, %v580_v42 }
 0x2f1   : > { %v592_v44 = vmul.f32 1.442695, %v586_v43  ;;  %v235_v63 = vpop.permute.xlu1 %234 }
 0x2f2   : > { %v583_v45 = vpop.xlane.xlu0 %582  ;;  %v4965_v20 = vadd.f32 %v4927_v34, %v235_v63 }
 0x2f3   : > { %4584 = vpow2.f32 %v592_v44  ;;  %v587_v46 = vsub.f32 %v4274_v28, %v583_v45 }
 0x2f4   : > { %v4581_v47 = vpop.eup %4580 }
 0x2f5   : > { %v594_v48 = vmul.f32 1.442695, %v587_v46  ;;  %v599_v49 = vsel %vm237_vm0, %v4581_v47, 0.0  ;;  %v4583_v50 = vpop.eup %4582 }
 0x2f6   : > { %600 = vadd.xlane.f32.xlu0 %v599_v49  ;;  %v596_v51 = vsel %vm237_vm0, %v4583_v50, 0.0  ;;  %v777_v59 = vpop.permute.xlu0 %776 }
 0x2f7   : > { %4586 = vpow2.f32 %v594_v48 }
 0x2fa   : > { %597 = vadd.xlane.f32.xlu0 %v596_v51 }
 0x2fd   : > { %v4585_v52 = vpop.eup %4584 }
 0x2fe   : > { %v602_v53 = vsel %vm237_vm0, %v4585_v52, 0.0 }
 0x2ff   : > { %603 = vadd.xlane.f32.xlu1 %v602_v53 }
 0x301   : > { %v4587_v54 = vpop.eup %4586 }
 0x302   : > { %v605_v55 = vsel %vm237_vm0, %v4587_v54, 0.0 }
 0x303   : > { %606 = vadd.xlane.f32.xlu0 %v605_v55 }
 0x310   : > { %929 = vrot.lane.b32.xlu1 %v4888_v16, %s4773_s28 }
 0x319   : > { %844 = vrot.lane.b32.xlu0 %v4881_v13, %s4773_s28 }
 0x337   : > { %780 = vxpose.xlu0.b32.start.end [1/1] (short) (narrow) %v775_v58, 16 }
 0x339   : > { %812 = vxpose.xlu1.b32.start.end [1/1] (short) (narrow) %v777_v59, 16 }
 0x383   : > { %v601_v61 = vpop.xlane.xlu0 %600 }
 0x384   : > { %4588 = vrcp.f32 %v601_v61 }
 0x387   : > { %v598_v62 = vpop.xlane.xlu0 %597 }
 0x388   : > { %4590 = vrcp.f32 %v598_v62 }
 0x38c   : > { %v604_v0 = vpop.xlane.xlu1 %603 }
 0x38d   : > { %4592 = vrcp.f32 %v604_v0 }
 0x38e   : > { %v4589_v1 = vpop.eup %4588 }
 0x38f   : > { %v613_v4 = vmul.f32 %v4589_v1, %v4581_v47 }
 0x390   : > { %v607_v2 = vpop.xlane.xlu0 %606  ;;  %v930_v19 = vpop.permute.xlu1 %929 }
 0x391   : > { %4594 = vrcp.f32 %v607_v2 }
 0x392   : > { %v4591_v3 = vpop.eup %4590 }
 0x393   : > { %v612_v5 = vmul.f32 %v4591_v3, %v4583_v50 }
 0x394   : > { %v845_v8 = vpop.permute.xlu0 %844 }
 0x395   : > { %v4462_v7 = vpack.c.bf16 %v613_v4, %v612_v5 }
 0x397   : > { %4464 = vmatpush3.bf16.xpose.msk.msra.mxu0 %vm4947_vm4, %v4462_v7  ;;  %v4593_v9 = vpop.eup %4592 }
 0x398   : > { %4289 = vmatprep.subr.msk.mxu0 %vm411_vm1, %v845_v8  ;;  %v614_v12 = vmul.f32 %v4593_v9, %v4585_v52 }
 0x39b   : > { %v4595_v10 = vpop.eup %4594 }
 0x39c   : > { %v615_v14 = vmul.f32 %v4595_v10, %v4587_v54 }
 0x39e   : > { %4280 = vmatmul.mubr.msk.f32.vlgmr.msra.gmra.mrb[4].mxu0 %vm237_vm0, %v4955_v11  ;;  %v4466_v18 = vpack.c.bf16 %v615_v14, %v614_v12 }
 0x39f   : > { %4290 = vmatpush3.msk.msra.mxu0 %vm411_vm1, %v845_v8 }
 0x3a0   : > { %4468 = vmatpush3.bf16.xpose.msk.msra.mxu1 %vm4947_vm4, %v4466_v18  ;;  %4469 = vmatprep.subr.bf16.mxu0 %v4774_v56 }
 0x3a1   : > { %4294 = vmatprep.subr.msk.mxu1 %vm411_vm1, %v930_v19 }
 0x3a7   : > { %4287 = vmatmul.mubr.msk.f32.vlgmr.msra.gmra.mrb[4].mxu1 %vm237_vm0, %v4965_v20 }
 0x3a8   : > { %4295 = vmatpush3.msk.msra.mxu1 %vm411_vm1, %v930_v19 }
 0x3a9   : > { %4473 = vmatprep.subr.bf16.mxu1 %v4774_v56 }
 0x3b7   : > { %v796_v21 = vpop.trf.xlu0 }
 0x3b8   : > { %4291 = vmatprep.mubr.msk.f32.mxu0 %vm404_vm2, %v796_v21 }
 0x3b9   : > { %v828_v22 = vpop.trf.xlu1 }
 0x3ba   : > { %4296 = vmatprep.mubr.msk.f32.mxu1 %vm404_vm2, %v828_v22 }
 0x3bb   : > { %v797_v23 = vpop.trf.xlu0 }
 0x3bc   : > { %4292 = vmatmul.mubr.msk.f32.vlgmr.msra.gmra.mrb[6].mxu0 %vm404_vm2, %v797_v23 }
 0x3bd   : > { %v829_v24 = vpop.trf.xlu1  ;;  %4303 = vmatprep.mubr.msk.f32.mxu0 %vm4775_vm3, %v4776_v57 }
 0x3be   : > { %4297 = vmatmul.mubr.msk.f32.vlgmr.msra.gmra.mrb[6].mxu1 %vm404_vm2, %v829_v24 }
 0x3bf   : > { %4310 = vmatprep.mubr.msk.f32.mxu1 %vm4775_vm3, %v4776_v57 }
 0x471   : > { %v4979_v25 = vpop.f32.mrb[4].mxu0 }
 0x472   : > { %v4281_v26 = vpop.f32.mrb[5].mxu0 }
 0x47a   : > { %v4981_v27 = vpop.f32.mrb[4].mxu1 }
 0x47b   : > { %v4288_v28 = vpop.f32.mrb[5].mxu1 }
 0x48f   : > { %v4293_v29 = vpop.f32.mrb[6].mxu0 }
 0x490   : > { %v920_v30 = vpop.f32.mrb[7].mxu0  ;;  %v1017_v31 = vsel %vm237_vm0, %v4293_v29, -inf }
 0x491   : > { %1018 = vmax.xlane.f32.xlu1 %v1017_v31  ;;  %v1014_v32 = vsel %vm237_vm0, %v920_v30, -inf  ;;  %v4298_v33 = vpop.f32.mrb[6].mxu1 }
 0x492   : > { %1015 = vmax.xlane.f32.xlu0 %v1014_v32  ;;  %v1005_v34 = vpop.f32.mrb[7].mxu1  ;;  %v1023_v36 = vsel %vm237_vm0, %v4298_v33, -inf }
 0x493   : > { %v1020_v35 = vsel %vm237_vm0, %v1005_v34, -inf }
 0x496   : > { %1021 = vmax.xlane.f32.xlu0 %v1020_v35 }
 0x49a   : > { %1024 = vmax.xlane.f32.xlu0 %v1023_v36 }
 0x4a2   : > { %1218 = vrot.lane.b32.xlu1 %v4883_v15, %s4777_s7 }
 0x4a6   : > { %1058 = vrot.lane.b32.xlu1 %v4955_v11, %s4773_s28 }
 0x4aa   : > { %1138 = vrot.lane.b32.xlu1 %v4965_v20, %s4773_s28 }
 0x4b0   : > { %1220 = vrot.lane.b32.xlu0 %v4896_v17, %s4777_s7 }
 0x51e   : > { %v1019_v37 = vpop.xlane.xlu1 %1018 }
 0x51f   : > { %v1027_v38 = vsub.f32 %v4293_v29, %v1019_v37  ;;  %v1016_v39 = vpop.xlane.xlu0 %1015 }
 0x520   : > { %v1026_v40 = vsub.f32 %v920_v30, %v1016_v39 }
 0x521   : > { %v1032_v41 = vmul.f32 1.442695, %v1027_v38 }
 0x522   : > { %v1030_v42 = vmul.f32 1.442695, %v1026_v40  ;;  %v1219_v59 = vpop.permute.xlu1 %1218 }
 0x523   : > { %4596 = vpow2.f32 %v1032_v41  ;;  %v1022_v43 = vpop.xlane.xlu0 %1021 }
 0x524   : > { %4598 = vpow2.f32 %v1030_v42  ;;  %v1028_v44 = vsub.f32 %v1005_v34, %v1022_v43 }
 0x526   : > { %v1034_v45 = vmul.f32 1.442695, %v1028_v44  ;;  %v1059_v61 = vpop.permute.xlu1 %1058 }
 0x527   : > { %v1025_v46 = vpop.xlane.xlu0 %1024 }
 0x528   : > { %4600 = vpow2.f32 %v1034_v45  ;;  %v1029_v47 = vsub.f32 %v4298_v33, %v1025_v46 }
 0x52a   : > { %v1036_v48 = vmul.f32 1.442695, %v1029_v47  ;;  %v1139_v62 = vpop.permute.xlu1 %1138 }
 0x52b   : > { %v1221_v60 = vpop.permute.xlu0 %1220 }
 0x52c   : > { %4602 = vpow2.f32 %v1036_v48 }
 0x52d   : > { %v4597_v49 = vpop.eup %4596 }
 0x52e   : > { %v4599_v50 = vpop.eup %4598  ;;  %v1041_v51 = vsel %vm237_vm0, %v4597_v49, 0.0 }
 0x52f   : > { %1042 = vadd.xlane.f32.xlu0 %v1041_v51  ;;  %v1038_v52 = vsel %vm237_vm0, %v4599_v50, 0.0 }
 0x530   : > { %1039 = vadd.xlane.f32.xlu1 %v1038_v52 }
 0x532   : > { %v4601_v53 = vpop.eup %4600 }
 0x533   : > { %v1044_v54 = vsel %vm237_vm0, %v4601_v53, 0.0 }
 0x534   : > { %1045 = vadd.xlane.f32.xlu1 %v1044_v54 }
 0x536   : > { %v4603_v55 = vpop.eup %4602 }
 0x537   : > { %v1047_v58 = vsel %vm237_vm0, %v4603_v55, 0.0 }
 0x538   : > { %1048 = vadd.xlane.f32.xlu0 %v1047_v58 }
 0x545   : > { %1373 = vrot.lane.b32.xlu1 %v4888_v16, %s4777_s7 }
 0x54e   : > { %1288 = vrot.lane.b32.xlu0 %v4881_v13, %s4777_s7 }
 0x56c   : > { %1224 = vxpose.xlu0.b32.start.end [1/1] (short) (narrow) %v1219_v59, 16 }
 0x56e   : > { %1256 = vxpose.xlu1.b32.start.end [1/1] (short) (narrow) %v1221_v60, 16 }
 0x5bc   : > { %v1043_v63 = vpop.xlane.xlu0 %1042 }
 0x5bd   : > { %4604 = vrcp.f32 %v1043_v63  ;;  %v1040_v0 = vpop.xlane.xlu1 %1039 }
 0x5be   : > { %4606 = vrcp.f32 %v1040_v0 }
 0x5c1   : > { %v1046_v1 = vpop.xlane.xlu1 %1045 }
 0x5c2   : > { %4608 = vrcp.f32 %v1046_v1 }
 0x5c5   : > { %v1049_v2 = vpop.xlane.xlu0 %1048  ;;  %v1374_v21 = vpop.permute.xlu1 %1373 }
 0x5c6   : > { %4610 = vrcp.f32 %v1049_v2 }
 0x5c7   : > { %v4605_v3 = vpop.eup %4604 }
 0x5c8   : > { %v4607_v4 = vpop.eup %4606  ;;  %v1055_v5 = vmul.f32 %v4605_v3, %v4597_v49 }
 0x5c9   : > { %v1054_v7 = vmul.f32 %v4607_v4, %v4599_v50  ;;  %v1289_v9 = vpop.permute.xlu0 %1288 }
 0x5cb   : > { %v4470_v8 = vpack.c.bf16 %v1055_v5, %v1054_v7 }
 0x5cc   : > { %v4609_v10 = vpop.eup %4608 }
 0x5cd   : > { %4472 = vmatpush3.bf16.xpose.msk.msra.mxu0 %vm4947_vm4, %v4470_v8  ;;  %v1056_v14 = vmul.f32 %v4609_v10, %v4601_v53 }
 0x5ce   : > { %4313 = vmatprep.subr.msk.mxu0 %vm411_vm1, %v1289_v9 }
 0x5d0   : > { %v4611_v12 = vpop.eup %4610 }
 0x5d1   : > { %v1057_v18 = vmul.f32 %v4611_v12, %v4603_v55 }
 0x5d3   : > { %v4474_v19 = vpack.c.bf16 %v1057_v18, %v1056_v14 }
 0x5d4   : > { %4304 = vmatmul.mubr.msk.f32.vlgmr.msra.gmra.mrb[8].mxu0 %vm237_vm0, %v1059_v61 }
 0x5d5   : > { %4476 = vmatpush3.bf16.xpose.msk.msra.mxu1 %vm4947_vm4, %v4474_v19  ;;  %4314 = vmatpush3.msk.msra.mxu0 %vm411_vm1, %v1289_v9 }
 0x5d6   : > { %4318 = vmatprep.subr.msk.mxu1 %vm411_vm1, %v1374_v21  ;;  %4477 = vmatprep.subr.bf16.mxu0 %v4774_v56 }
 0x5dc   : > { %4311 = vmatmul.mubr.msk.f32.vlgmr.msra.gmra.mrb[8].mxu1 %vm237_vm0, %v1139_v62 }
 0x5dd   : > { %4319 = vmatpush3.msk.msra.mxu1 %vm411_vm1, %v1374_v21 }
 0x5de   : > { %4481 = vmatprep.subr.bf16.mxu1 %v4774_v56 }
 0x5ec   : > { %v1240_v22 = vpop.trf.xlu0 }
 0x5ed   : > { %4315 = vmatprep.mubr.msk.f32.mxu0 %vm404_vm2, %v1240_v22 }
 0x5ee   : > { %v1272_v23 = vpop.trf.xlu1 }
 0x5ef   : > { %4320 = vmatprep.mubr.msk.f32.mxu1 %vm404_vm2, %v1272_v23 }
 0x5f0   : > { %v1241_v24 = vpop.trf.xlu0 }
 0x5f1   : > { %4316 = vmatmul.mubr.msk.f32.vlgmr.msra.gmra.mrb[10].mxu0 %vm404_vm2, %v1241_v24 }
 0x5f2   : > { %v1273_v26 = vpop.trf.xlu1  ;;  %4327 = vmatprep.mubr.msk.f32.mxu0 %vm4775_vm3, %v4776_v57 }
 0x5f3   : > { %4321 = vmatmul.mubr.msk.f32.vlgmr.msra.gmra.mrb[10].mxu1 %vm404_vm2, %v1273_v26 }
 0x5f4   : > { %4334 = vmatprep.mubr.msk.f32.mxu1 %vm4775_vm3, %v4776_v57 }
 0x6a7   : > { %v5023_v28 = vpop.f32.mrb[8].mxu0 }
 0x6a8   : > { %v4305_v29 = vpop.f32.mrb[9].mxu0 }
 0x6af   : > { %v5025_v30 = vpop.f32.mrb[8].mxu1 }
 0x6b0   : > { %v4312_v31 = vpop.f32.mrb[9].mxu1 }
 0x6c4   : > { %v4317_v32 = vpop.f32.mrb[10].mxu0 }
 0x6c5   : > { %v1364_v33 = vpop.f32.mrb[11].mxu0  ;;  %v1461_v34 = vsel %vm237_vm0, %v4317_v32, -inf }
 0x6c6   : > { %1462 = vmax.xlane.f32.xlu1 %v1461_v34  ;;  %v1458_v35 = vsel %vm237_vm0, %v1364_v33, -inf  ;;  %v4322_v36 = vpop.f32.mrb[10].mxu1 }
 0x6c7   : > { %1459 = vmax.xlane.f32.xlu0 %v1458_v35  ;;  %v1449_v37 = vpop.f32.mrb[11].mxu1  ;;  %v1467_v39 = vsel %vm237_vm0, %v4322_v36, -inf }
 0x6c8   : > { %v1464_v38 = vsel %vm237_vm0, %v1449_v37, -inf }
 0x6cb   : > { %1465 = vmax.xlane.f32.xlu0 %v1464_v38 }
 0x6cf   : > { %1468 = vmax.xlane.f32.xlu0 %v1467_v39 }
 0x6d7   : > { %1662 = vrot.lane.b32.xlu1 %v4883_v15, %s4778_s8 }
 0x6db   : > { %1502 = vrot.lane.b32.xlu1 %v4955_v11, %s4777_s7 }
 0x6df   : > { %1582 = vrot.lane.b32.xlu1 %v4965_v20, %s4777_s7 }
 0x6e5   : > { %1664 = vrot.lane.b32.xlu0 %v4896_v17, %s4778_s8 }
 0x753   : > { %v1463_v40 = vpop.xlane.xlu1 %1462 }
 0x754   : > { %v1471_v41 = vsub.f32 %v4317_v32, %v1463_v40  ;;  %v1460_v42 = vpop.xlane.xlu0 %1459 }
 0x755   : > { %v1470_v43 = vsub.f32 %v1364_v33, %v1460_v42 }
 0x756   : > { %v1476_v44 = vmul.f32 1.442695, %v1471_v41 }
 0x757   : > { %v1474_v45 = vmul.f32 1.442695, %v1470_v43  ;;  %v1663_v62 = vpop.permute.xlu1 %1662 }
 0x758   : > { %4612 = vpow2.f32 %v1476_v44  ;;  %v1466_v46 = vpop.xlane.xlu0 %1465 }
 0x759   : > { %4614 = vpow2.f32 %v1474_v45  ;;  %v1472_v47 = vsub.f32 %v1449_v37, %v1466_v46 }
 0x75b   : > { %v1478_v48 = vmul.f32 1.442695, %v1472_v47  ;;  %v1503_v0 = vpop.permute.xlu1 %1502 }
 0x75c   : > { %v1469_v49 = vpop.xlane.xlu0 %1468 }
 0x75d   : > { %4616 = vpow2.f32 %v1478_v48  ;;  %v1473_v50 = vsub.f32 %v4322_v36, %v1469_v49 }
 0x75f   : > { %v1480_v51 = vmul.f32 1.442695, %v1473_v50  ;;  %v1583_v1 = vpop.permute.xlu1 %1582 }
 0x760   : > { %v1665_v63 = vpop.permute.xlu0 %1664 }
 0x761   : > { %4618 = vpow2.f32 %v1480_v51 }
 0x762   : > { %v4613_v52 = vpop.eup %4612 }
 0x763   : > { %v4615_v53 = vpop.eup %4614  ;;  %v1485_v54 = vsel %vm237_vm0, %v4613_v52, 0.0 }
 0x764   : > { %1486 = vadd.xlane.f32.xlu0 %v1485_v54  ;;  %v1482_v55 = vsel %vm237_vm0, %v4615_v53, 0.0 }
 0x765   : > { %1483 = vadd.xlane.f32.xlu1 %v1482_v55 }
 0x767   : > { %v4617_v58 = vpop.eup %4616 }
 0x768   : > { %v1488_v59 = vsel %vm237_vm0, %v4617_v58, 0.0 }
 0x769   : > { %1489 = vadd.xlane.f32.xlu1 %v1488_v59 }
 0x76b   : > { %v4619_v60 = vpop.eup %4618 }
 0x76c   : > { %v1491_v61 = vsel %vm237_vm0, %v4619_v60, 0.0 }
 0x76d   : > { %1492 = vadd.xlane.f32.xlu0 %v1491_v61 }
 0x77a   : > { %1817 = vrot.lane.b32.xlu1 %v4888_v16, %s4778_s8 }
 0x783   : > { %1732 = vrot.lane.b32.xlu0 %v4881_v13, %s4778_s8 }
 0x7a1   : > { %1668 = vxpose.xlu0.b32.start.end [1/1] (short) (narrow) %v1663_v62, 16 }
 0x7a3   : > { %1700 = vxpose.xlu1.b32.start.end [1/1] (short) (narrow) %v1665_v63, 16 }
 0x7f1   : > { %v1487_v2 = vpop.xlane.xlu0 %1486 }
 0x7f2   : > { %4620 = vrcp.f32 %v1487_v2  ;;  %v1484_v3 = vpop.xlane.xlu1 %1483 }
 0x7f3   : > { %4622 = vrcp.f32 %v1484_v3 }
 0x7f6   : > { %v1490_v4 = vpop.xlane.xlu1 %1489 }
 0x7f7   : > { %4624 = vrcp.f32 %v1490_v4 }
 0x7fa   : > { %v1493_v5 = vpop.xlane.xlu0 %1492  ;;  %v1818_v24 = vpop.permute.xlu1 %1817 }
 0x7fb   : > { %4626 = vrcp.f32 %v1493_v5 }
 0x7fc   : > { %v4621_v7 = vpop.eup %4620 }
 0x7fd   : > { %v4623_v8 = vpop.eup %4622  ;;  %v1499_v9 = vmul.f32 %v4621_v7, %v4613_v52 }
 0x7fe   : > { %v1498_v10 = vmul.f32 %v4623_v8, %v4615_v53  ;;  %v1733_v14 = vpop.permute.xlu0 %1732 }
 0x800   : > { %v4478_v12 = vpack.c.bf16 %v1499_v9, %v1498_v10 }
 0x801   : > { %v4625_v18 = vpop.eup %4624 }
 0x802   : > { %4480 = vmatpush3.bf16.xpose.msk.msra.mxu0 %vm4947_vm4, %v4478_v12  ;;  %v1500_v21 = vmul.f32 %v4625_v18, %v4617_v58 }
 0x803   : > { %4337 = vmatprep.subr.msk.mxu0 %vm411_vm1, %v1733_v14 }
 0x805   : > { %v4627_v19 = vpop.eup %4626 }
 0x806   : > { %v1501_v22 = vmul.f32 %v4627_v19, %v4619_v60 }
 0x808   : > { %v4482_v23 = vpack.c.bf16 %v1501_v22, %v1500_v21 }
 0x809   : > { %4328 = vmatmul.mubr.msk.f32.vlgmr.msra.gmra.mrb[12].mxu0 %vm237_vm0, %v1503_v0 }
 0x80a   : > { %4484 = vmatpush3.bf16.xpose.msk.msra.mxu1 %vm4947_vm4, %v4482_v23  ;;  %4338 = vmatpush3.msk.msra.mxu0 %vm411_vm1, %v1733_v14 }
 0x80b   : > { %4342 = vmatprep.subr.msk.mxu1 %vm411_vm1, %v1818_v24  ;;  %4485 = vmatprep.subr.bf16.mxu0 %v4774_v56 }
 0x811   : > { %4335 = vmatmul.mubr.msk.f32.vlgmr.msra.gmra.mrb[12].mxu1 %vm237_vm0, %v1583_v1 }
 0x812   : > { %4343 = vmatpush3.msk.msra.mxu1 %vm411_vm1, %v1818_v24 }
 0x813   : > { %4489 = vmatprep.subr.bf16.mxu1 %v4774_v56 }
 0x821   : > { %v1684_v26 = vpop.trf.xlu0 }
 0x822   : > { %4339 = vmatprep.mubr.msk.f32.mxu0 %vm404_vm2, %v1684_v26 }
 0x823   : > { %v1716_v29 = vpop.trf.xlu1 }
 0x824   : > { %4344 = vmatprep.mubr.msk.f32.mxu1 %vm404_vm2, %v1716_v29 }
 0x825   : > { %v1685_v31 = vpop.trf.xlu0 }
 0x826   : > { %4340 = vmatmul.mubr.msk.f32.vlgmr.msra.gmra.mrb[14].mxu0 %vm404_vm2, %v1685_v31 }
 0x827   : > { %v1717_v32 = vpop.trf.xlu1  ;;  %4351 = vmatprep.mubr.msk.f32.mxu0 %vm4775_vm3, %v4776_v57 }
 0x828   : > { %4345 = vmatmul.mubr.msk.f32.vlgmr.msra.gmra.mrb[14].mxu1 %vm404_vm2, %v1717_v32 }
 0x829   : > { %4358 = vmatprep.mubr.msk.f32.mxu1 %vm4775_vm3, %v4776_v57 }
 0x8dc   : > { %v5067_v33 = vpop.f32.mrb[12].mxu0 }
 0x8dd   : > { %v4329_v34 = vpop.f32.mrb[13].mxu0 }
 0x8e4   : > { %v5069_v35 = vpop.f32.mrb[12].mxu1 }
 0x8e5   : > { %v4336_v36 = vpop.f32.mrb[13].mxu1 }
 0x8f9   : > { %v4341_v37 = vpop.f32.mrb[14].mxu0 }
 0x8fa   : > { %v1808_v38 = vpop.f32.mrb[15].mxu0  ;;  %v1905_v39 = vsel %vm237_vm0, %v4341_v37, -inf }
 0x8fb   : > { %1906 = vmax.xlane.f32.xlu1 %v1905_v39  ;;  %v1902_v40 = vsel %vm237_vm0, %v1808_v38, -inf  ;;  %v4346_v41 = vpop.f32.mrb[14].mxu1 }
 0x8fc   : > { %1903 = vmax.xlane.f32.xlu0 %v1902_v40  ;;  %v1893_v42 = vpop.f32.mrb[15].mxu1  ;;  %v1911_v44 = vsel %vm237_vm0, %v4346_v41, -inf }
 0x8fd   : > { %v1908_v43 = vsel %vm237_vm0, %v1893_v42, -inf }
 0x900   : > { %1909 = vmax.xlane.f32.xlu0 %v1908_v43 }
 0x904   : > { %1912 = vmax.xlane.f32.xlu0 %v1911_v44 }
 0x90c   : > { %2106 = vrot.lane.b32.xlu1 %v4883_v15, %s4779_s10 }
 0x910   : > { %1946 = vrot.lane.b32.xlu1 %v4955_v11, %s4778_s8 }
 0x914   : > { %2026 = vrot.lane.b32.xlu1 %v4965_v20, %s4778_s8 }
 0x91a   : > { %2108 = vrot.lane.b32.xlu0 %v4896_v17, %s4779_s10 }
 0x988   : > { %v1907_v45 = vpop.xlane.xlu1 %1906 }
 0x989   : > { %v1915_v46 = vsub.f32 %v4341_v37, %v1907_v45  ;;  %v1904_v47 = vpop.xlane.xlu0 %1903 }
 0x98a   : > { %v1914_v48 = vsub.f32 %v1808_v38, %v1904_v47 }
 0x98b   : > { %v1920_v49 = vmul.f32 1.442695, %v1915_v46 }
 0x98c   : > { %v1918_v50 = vmul.f32 1.442695, %v1914_v48  ;;  %v2107_v3 = vpop.permute.xlu1 %2106 }
 0x98d   : > { %4628 = vpow2.f32 %v1920_v49  ;;  %v1910_v51 = vpop.xlane.xlu0 %1909 }
 0x98e   : > { %4630 = vpow2.f32 %v1918_v50  ;;  %v1916_v52 = vsub.f32 %v1893_v42, %v1910_v51 }
 0x990   : > { %v1922_v53 = vmul.f32 1.442695, %v1916_v52  ;;  %v1947_v5 = vpop.permute.xlu1 %1946 }
 0x991   : > { %v1913_v54 = vpop.xlane.xlu0 %1912 }
 0x992   : > { %4632 = vpow2.f32 %v1922_v53  ;;  %v1917_v55 = vsub.f32 %v4346_v41, %v1913_v54 }
 0x994   : > { %v1924_v58 = vmul.f32 1.442695, %v1917_v55  ;;  %v2027_v7 = vpop.permute.xlu1 %2026 }
 0x995   : > { %v2109_v4 = vpop.permute.xlu0 %2108 }
 0x996   : > { %4634 = vpow2.f32 %v1924_v58 }
 0x997   : > { %v4629_v59 = vpop.eup %4628 }
 0x998   : > { %v4631_v60 = vpop.eup %4630  ;;  %v1929_v61 = vsel %vm237_vm0, %v4629_v59, 0.0 }
 0x999   : > { %1930 = vadd.xlane.f32.xlu0 %v1929_v61  ;;  %v1926_v62 = vsel %vm237_vm0, %v4631_v60, 0.0 }
 0x99a   : > { %1927 = vadd.xlane.f32.xlu1 %v1926_v62 }
 0x99c   : > { %v4633_v63 = vpop.eup %4632 }
 0x99d   : > { %v1932_v0 = vsel %vm237_vm0, %v4633_v63, 0.0 }
 0x99e   : > { %1933 = vadd.xlane.f32.xlu1 %v1932_v0 }
 0x9a0   : > { %v4635_v1 = vpop.eup %4634 }
 0x9a1   : > { %v1935_v2 = vsel %vm237_vm0, %v4635_v1, 0.0 }
 0x9a2   : > { %1936 = vadd.xlane.f32.xlu0 %v1935_v2 }
 0x9af   : > { %2261 = vrot.lane.b32.xlu1 %v4888_v16, %s4779_s10 }
 0x9b8   : > { %2176 = vrot.lane.b32.xlu0 %v4881_v13, %s4779_s10 }
 0x9d6   : > { %2112 = vxpose.xlu0.b32.start.end [1/1] (short) (narrow) %v2107_v3, 16 }
 0x9d8   : > { %2144 = vxpose.xlu1.b32.start.end [1/1] (short) (narrow) %v2109_v4, 16 }
 0xa26   : > { %v1931_v8 = vpop.xlane.xlu0 %1930 }
 0xa27   : > { %4636 = vrcp.f32 %v1931_v8  ;;  %v1928_v9 = vpop.xlane.xlu1 %1927 }
 0xa28   : > { %4638 = vrcp.f32 %v1928_v9 }
 0xa2b   : > { %v1934_v10 = vpop.xlane.xlu1 %1933 }
 0xa2c   : > { %4640 = vrcp.f32 %v1934_v10 }
 0xa2f   : > { %v1937_v12 = vpop.xlane.xlu0 %1936  ;;  %v2262_v34 = vpop.permute.xlu1 %2261 }
 0xa30   : > { %4642 = vrcp.f32 %v1937_v12 }
 0xa31   : > { %v4637_v14 = vpop.eup %4636 }
 0xa32   : > { %v4639_v18 = vpop.eup %4638  ;;  %v1943_v19 = vmul.f32 %v4637_v14, %v4629_v59 }
 0xa33   : > { %v1942_v21 = vmul.f32 %v4639_v18, %v4631_v60  ;;  %v2177_v23 = vpop.permute.xlu0 %2176 }
 0xa35   : > { %v4486_v22 = vpack.c.bf16 %v1943_v19, %v1942_v21 }
 0xa36   : > { %v4641_v24 = vpop.eup %4640 }
 0xa37   : > { %4488 = vmatpush3.bf16.xpose.msk.msra.mxu0 %vm4947_vm4, %v4486_v22  ;;  %v1944_v29 = vmul.f32 %v4641_v24, %v4633_v63 }
 0xa38   : > { %4361 = vmatprep.subr.msk.mxu0 %vm411_vm1, %v2177_v23 }
 0xa3a   : > { %v4643_v26 = vpop.eup %4642 }
 0xa3b   : > { %v1945_v31 = vmul.f32 %v4643_v26, %v4635_v1 }
 0xa3d   : > { %v4490_v32 = vpack.c.bf16 %v1945_v31, %v1944_v29 }
 0xa3e   : > { %4352 = vmatmul.mubr.msk.f32.vlgmr.msra.gmra.mrb[16].mxu0 %vm237_vm0, %v1947_v5 }
 0xa3f   : > { %4492 = vmatpush3.bf16.xpose.msk.msra.mxu1 %vm4947_vm4, %v4490_v32  ;;  %4362 = vmatpush3.msk.msra.mxu0 %vm411_vm1, %v2177_v23 }
 0xa40   : > { %4366 = vmatprep.subr.msk.mxu1 %vm411_vm1, %v2262_v34  ;;  %4493 = vmatprep.subr.bf16.mxu0 %v4774_v56 }
 0xa46   : > { %4359 = vmatmul.mubr.msk.f32.vlgmr.msra.gmra.mrb[16].mxu1 %vm237_vm0, %v2027_v7 }
 0xa47   : > { %4367 = vmatpush3.msk.msra.mxu1 %vm411_vm1, %v2262_v34 }
 0xa48   : > { %4497 = vmatprep.subr.bf16.mxu1 %v4774_v56 }
 0xa56   : > { %v2128_v36 = vpop.trf.xlu0 }
 0xa57   : > { %4363 = vmatprep.mubr.msk.f32.mxu0 %vm404_vm2, %v2128_v36 }
 0xa58   : > { %v2160_v37 = vpop.trf.xlu1 }
 0xa59   : > { %4368 = vmatprep.mubr.msk.f32.mxu1 %vm404_vm2, %v2160_v37 }
 0xa5a   : > { %v2129_v38 = vpop.trf.xlu0 }
 0xa5b   : > { %4364 = vmatmul.mubr.msk.f32.vlgmr.msra.gmra.mrb[18].mxu0 %vm404_vm2, %v2129_v38 }
 0xa5c   : > { %v2161_v39 = vpop.trf.xlu1  ;;  %4375 = vmatprep.mubr.msk.f32.mxu0 %vm4775_vm3, %v4776_v57 }
 0xa5d   : > { %4369 = vmatmul.mubr.msk.f32.vlgmr.msra.gmra.mrb[18].mxu1 %vm404_vm2, %v2161_v39 }
 0xa5e   : > { %4382 = vmatprep.mubr.msk.f32.mxu1 %vm4775_vm3, %v4776_v57 }
 0xb11   : > { %v5111_v40 = vpop.f32.mrb[16].mxu0 }
 0xb12   : > { %v4353_v41 = vpop.f32.mrb[17].mxu0 }
 0xb19   : > { %v5113_v42 = vpop.f32.mrb[16].mxu1 }
 0xb1a   : > { %v4360_v43 = vpop.f32.mrb[17].mxu1 }
 0xb2e   : > { %v4365_v44 = vpop.f32.mrb[18].mxu0 }
 0xb2f   : > { %v2252_v45 = vpop.f32.mrb[19].mxu0  ;;  %v2349_v46 = vsel %vm237_vm0, %v4365_v44, -inf }
 0xb30   : > { %2350 = vmax.xlane.f32.xlu1 %v2349_v46  ;;  %v2346_v47 = vsel %vm237_vm0, %v2252_v45, -inf  ;;  %v4370_v48 = vpop.f32.mrb[18].mxu1 }
 0xb31   : > { %2347 = vmax.xlane.f32.xlu0 %v2346_v47  ;;  %v2337_v49 = vpop.f32.mrb[19].mxu1  ;;  %v2355_v51 = vsel %vm237_vm0, %v4370_v48, -inf }
 0xb32   : > { %v2352_v50 = vsel %vm237_vm0, %v2337_v49, -inf }
 0xb35   : > { %2353 = vmax.xlane.f32.xlu0 %v2352_v50 }
 0xb39   : > { %2356 = vmax.xlane.f32.xlu0 %v2355_v51 }
 0xb41   : > { %2550 = vrot.lane.b32.xlu1 %v4883_v15, %s4780_s11 }
 0xb45   : > { %2390 = vrot.lane.b32.xlu1 %v4955_v11, %s4779_s10 }
 0xb49   : > { %2470 = vrot.lane.b32.xlu1 %v4965_v20, %s4779_s10 }
 0xb4f   : > { %2552 = vrot.lane.b32.xlu0 %v4896_v17, %s4780_s11 }
 0xbbd   : > { %v2351_v52 = vpop.xlane.xlu1 %2350 }
 0xbbe   : > { %v2359_v53 = vsub.f32 %v4365_v44, %v2351_v52  ;;  %v2348_v54 = vpop.xlane.xlu0 %2347 }
 0xbbf   : > { %v2358_v55 = vsub.f32 %v2252_v45, %v2348_v54 }
 0xbc0   : > { %v2364_v58 = vmul.f32 1.442695, %v2359_v53 }
 0xbc1   : > { %v2362_v59 = vmul.f32 1.442695, %v2358_v55  ;;  %v2551_v12 = vpop.permute.xlu1 %2550 }
 0xbc2   : > { %4644 = vpow2.f32 %v2364_v58  ;;  %v2354_v60 = vpop.xlane.xlu0 %2353 }
 0xbc3   : > { %4646 = vpow2.f32 %v2362_v59  ;;  %v2360_v61 = vsub.f32 %v2337_v49, %v2354_v60 }
 0xbc5   : > { %v2366_v62 = vmul.f32 1.442695, %v2360_v61  ;;  %v2391_v18 = vpop.permute.xlu1 %2390 }
 0xbc6   : > { %v2357_v63 = vpop.xlane.xlu0 %2356 }
 0xbc7   : > { %4648 = vpow2.f32 %v2366_v62  ;;  %v2361_v0 = vsub.f32 %v4370_v48, %v2357_v63 }
 0xbc9   : > { %v2368_v1 = vmul.f32 1.442695, %v2361_v0  ;;  %v2471_v19 = vpop.permute.xlu1 %2470 }
 0xbca   : > { %v2553_v14 = vpop.permute.xlu0 %2552 }
 0xbcb   : > { %4650 = vpow2.f32 %v2368_v1 }
 0xbcc   : > { %v4645_v2 = vpop.eup %4644 }
 0xbcd   : > { %v4647_v3 = vpop.eup %4646  ;;  %v2373_v4 = vsel %vm237_vm0, %v4645_v2, 0.0 }
 0xbce   : > { %2374 = vadd.xlane.f32.xlu0 %v2373_v4  ;;  %v2370_v5 = vsel %vm237_vm0, %v4647_v3, 0.0 }
 0xbcf   : > { %2371 = vadd.xlane.f32.xlu1 %v2370_v5 }
 0xbd1   : > { %v4649_v7 = vpop.eup %4648 }
 0xbd2   : > { %v2376_v8 = vsel %vm237_vm0, %v4649_v7, 0.0 }
 0xbd3   : > { %2377 = vadd.xlane.f32.xlu1 %v2376_v8 }
 0xbd5   : > { %v4651_v9 = vpop.eup %4650 }
 0xbd6   : > { %v2379_v10 = vsel %vm237_vm0, %v4651_v9, 0.0 }
 0xbd7   : > { %2380 = vadd.xlane.f32.xlu0 %v2379_v10 }
 0xbe4   : > { %2705 = vrot.lane.b32.xlu1 %v4888_v16, %s4780_s11 }
 0xbed   : > { %2620 = vrot.lane.b32.xlu0 %v4881_v13, %s4780_s11 }
 0xc0b   : > { %2556 = vxpose.xlu0.b32.start.end [1/1] (short) (narrow) %v2551_v12, 16 }
 0xc0d   : > { %2588 = vxpose.xlu1.b32.start.end [1/1] (short) (narrow) %v2553_v14, 16 }
 0xc5b   : > { %v2375_v21 = vpop.xlane.xlu0 %2374 }
 0xc5c   : > { %4652 = vrcp.f32 %v2375_v21  ;;  %v2372_v22 = vpop.xlane.xlu1 %2371 }
 0xc5d   : > { %4654 = vrcp.f32 %v2372_v22 }
 0xc60   : > { %v2378_v23 = vpop.xlane.xlu1 %2377 }
 0xc61   : > { %4656 = vrcp.f32 %v2378_v23 }
 0xc64   : > { %v2381_v24 = vpop.xlane.xlu0 %2380  ;;  %v2706_v44 = vpop.permute.xlu1 %2705 }
 0xc65   : > { %4658 = vrcp.f32 %v2381_v24 }
 0xc66   : > { %v4653_v26 = vpop.eup %4652 }
 0xc67   : > { %v4655_v29 = vpop.eup %4654  ;;  %v2387_v31 = vmul.f32 %v4653_v26, %v4645_v2 }
 0xc68   : > { %v2386_v32 = vmul.f32 %v4655_v29, %v4647_v3  ;;  %v2621_v36 = vpop.permute.xlu0 %2620 }
 0xc6a   : > { %v4494_v34 = vpack.c.bf16 %v2387_v31, %v2386_v32 }
 0xc6b   : > { %v4657_v37 = vpop.eup %4656 }
 0xc6c   : > { %4496 = vmatpush3.bf16.xpose.msk.msra.mxu0 %vm4947_vm4, %v4494_v34  ;;  %v2388_v39 = vmul.f32 %v4657_v37, %v4649_v7 }
 0xc6d   : > { %4385 = vmatprep.subr.msk.mxu0 %vm411_vm1, %v2621_v36 }
 0xc6f   : > { %v4659_v38 = vpop.eup %4658 }
 0xc70   : > { %v2389_v41 = vmul.f32 %v4659_v38, %v4651_v9 }
 0xc72   : > { %v4498_v43 = vpack.c.bf16 %v2389_v41, %v2388_v39 }
 0xc73   : > { %4376 = vmatmul.mubr.msk.f32.vlgmr.msra.gmra.mrb[20].mxu0 %vm237_vm0, %v2391_v18 }
 0xc74   : > { %4500 = vmatpush3.bf16.xpose.msk.msra.mxu1 %vm4947_vm4, %v4498_v43  ;;  %4386 = vmatpush3.msk.msra.mxu0 %vm411_vm1, %v2621_v36 }
 0xc75   : > { %4390 = vmatprep.subr.msk.mxu1 %vm411_vm1, %v2706_v44  ;;  %4501 = vmatprep.subr.bf16.mxu0 %v4774_v56 }
 0xc7b   : > { %4383 = vmatmul.mubr.msk.f32.vlgmr.msra.gmra.mrb[20].mxu1 %vm237_vm0, %v2471_v19 }
 0xc7c   : > { %4391 = vmatpush3.msk.msra.mxu1 %vm411_vm1, %v2706_v44 }
 0xc7d   : > { %4505 = vmatprep.subr.bf16.mxu1 %v4774_v56 }
 0xc8b   : > { %v2572_v45 = vpop.trf.xlu0 }
 0xc8c   : > { %4387 = vmatprep.mubr.msk.f32.mxu0 %vm404_vm2, %v2572_v45 }
 0xc8d   : > { %v2604_v46 = vpop.trf.xlu1 }
 0xc8e   : > { %4392 = vmatprep.mubr.msk.f32.mxu1 %vm404_vm2, %v2604_v46 }
 0xc8f   : > { %v2573_v47 = vpop.trf.xlu0 }
 0xc90   : > { %4388 = vmatmul.mubr.msk.f32.vlgmr.msra.gmra.mrb[22].mxu0 %vm404_vm2, %v2573_v47 }
 0xc91   : > { %v2605_v48 = vpop.trf.xlu1  ;;  %4399 = vmatprep.mubr.msk.f32.mxu0 %vm4775_vm3, %v4776_v57 }
 0xc92   : > { %4393 = vmatmul.mubr.msk.f32.vlgmr.msra.gmra.mrb[22].mxu1 %vm404_vm2, %v2605_v48 }
 0xc93   : > { %4406 = vmatprep.mubr.msk.f32.mxu1 %vm4775_vm3, %v4776_v57 }
 0xd46   : > { %v5155_v49 = vpop.f32.mrb[20].mxu0 }
 0xd47   : > { %v4377_v50 = vpop.f32.mrb[21].mxu0 }
 0xd4e   : > { %v5157_v51 = vpop.f32.mrb[20].mxu1 }
 0xd4f   : > { %v4384_v52 = vpop.f32.mrb[21].mxu1 }
 0xd63   : > { %v4389_v53 = vpop.f32.mrb[22].mxu0 }
 0xd64   : > { %v2696_v54 = vpop.f32.mrb[23].mxu0  ;;  %v2793_v55 = vsel %vm237_vm0, %v4389_v53, -inf }
 0xd65   : > { %2794 = vmax.xlane.f32.xlu1 %v2793_v55  ;;  %v2790_v58 = vsel %vm237_vm0, %v2696_v54, -inf  ;;  %v4394_v59 = vpop.f32.mrb[22].mxu1 }
 0xd66   : > { %2791 = vmax.xlane.f32.xlu0 %v2790_v58  ;;  %v2781_v60 = vpop.f32.mrb[23].mxu1  ;;  %v2799_v62 = vsel %vm237_vm0, %v4394_v59, -inf }
 0xd67   : > { %v2796_v61 = vsel %vm237_vm0, %v2781_v60, -inf }
 0xd6a   : > { %2797 = vmax.xlane.f32.xlu0 %v2796_v61 }
 0xd6e   : > { %2800 = vmax.xlane.f32.xlu0 %v2799_v62 }
 0xd76   : > { %2994 = vrot.lane.b32.xlu1 %v4883_v15, %s4781_s17 }
 0xd7a   : > { %2834 = vrot.lane.b32.xlu1 %v4955_v11, %s4780_s11 }
 0xd7e   : > { %2914 = vrot.lane.b32.xlu1 %v4965_v20, %s4780_s11 }
 0xd84   : > { %2996 = vrot.lane.b32.xlu0 %v4896_v17, %s4781_s17 }
 0xdf2   : > { %v2795_v63 = vpop.xlane.xlu1 %2794 }
 0xdf3   : > { %v2803_v0 = vsub.f32 %v4389_v53, %v2795_v63  ;;  %v2792_v1 = vpop.xlane.xlu0 %2791 }
 0xdf4   : > { %v2802_v2 = vsub.f32 %v2696_v54, %v2792_v1 }
 0xdf5   : > { %v2808_v3 = vmul.f32 1.442695, %v2803_v0 }
 0xdf6   : > { %v2806_v4 = vmul.f32 1.442695, %v2802_v2  ;;  %v2995_v29 = vpop.permute.xlu1 %2994 }
 0xdf7   : > { %4660 = vpow2.f32 %v2808_v3  ;;  %v2798_v5 = vpop.xlane.xlu0 %2797 }
 0xdf8   : > { %4662 = vpow2.f32 %v2806_v4  ;;  %v2804_v7 = vsub.f32 %v2781_v60, %v2798_v5 }
 0xdfa   : > { %v2810_v8 = vmul.f32 1.442695, %v2804_v7  ;;  %v2835_v32 = vpop.permute.xlu1 %2834 }
 0xdfb   : > { %v2801_v9 = vpop.xlane.xlu0 %2800 }
 0xdfc   : > { %4664 = vpow2.f32 %v2810_v8  ;;  %v2805_v10 = vsub.f32 %v4394_v59, %v2801_v9 }
 0xdfe   : > { %v2812_v12 = vmul.f32 1.442695, %v2805_v10  ;;  %v2915_v34 = vpop.permute.xlu1 %2914 }
 0xdff   : > { %v2997_v31 = vpop.permute.xlu0 %2996 }
 0xe00   : > { %4666 = vpow2.f32 %v2812_v12 }
 0xe01   : > { %v4661_v14 = vpop.eup %4660 }
 0xe02   : > { %v4663_v18 = vpop.eup %4662  ;;  %v2817_v19 = vsel %vm237_vm0, %v4661_v14, 0.0 }
 0xe03   : > { %2818 = vadd.xlane.f32.xlu0 %v2817_v19  ;;  %v2814_v21 = vsel %vm237_vm0, %v4663_v18, 0.0 }
 0xe04   : > { %2815 = vadd.xlane.f32.xlu1 %v2814_v21 }
 0xe06   : > { %v4665_v22 = vpop.eup %4664 }
 0xe07   : > { %v2820_v23 = vsel %vm237_vm0, %v4665_v22, 0.0 }
 0xe08   : > { %2821 = vadd.xlane.f32.xlu1 %v2820_v23 }
 0xe0a   : > { %v4667_v24 = vpop.eup %4666 }
 0xe0b   : > { %v2823_v26 = vsel %vm237_vm0, %v4667_v24, 0.0 }
 0xe0c   : > { %2824 = vadd.xlane.f32.xlu0 %v2823_v26 }
 0xe19   : > { %3149 = vrot.lane.b32.xlu1 %v4888_v16, %s4781_s17 }
 0xe22   : > { %3064 = vrot.lane.b32.xlu0 %v4881_v13, %s4781_s17 }
 0xe40   : > { %3000 = vxpose.xlu0.b32.start.end [1/1] (short) (narrow) %v2995_v29, 16 }
 0xe42   : > { %3032 = vxpose.xlu1.b32.start.end [1/1] (short) (narrow) %v2997_v31, 16 }
 0xe90   : > { %v2819_v36 = vpop.xlane.xlu0 %2818 }
 0xe91   : > { %4668 = vrcp.f32 %v2819_v36  ;;  %v2816_v37 = vpop.xlane.xlu1 %2815 }
 0xe92   : > { %4670 = vrcp.f32 %v2816_v37 }
 0xe95   : > { %v2822_v38 = vpop.xlane.xlu1 %2821 }
 0xe96   : > { %4672 = vrcp.f32 %v2822_v38 }
 0xe99   : > { %v2825_v39 = vpop.xlane.xlu0 %2824  ;;  %v3150_v55 = vpop.permute.xlu1 %3149 }
 0xe9a   : > { %4674 = vrcp.f32 %v2825_v39 }
 0xe9b   : > { %v4669_v41 = vpop.eup %4668 }
 0xe9c   : > { %v4671_v43 = vpop.eup %4670  ;;  %v2831_v44 = vmul.f32 %v4669_v41, %v4661_v14 }
 0xe9d   : > { %v2830_v45 = vmul.f32 %v4671_v43, %v4663_v18  ;;  %v3065_v47 = vpop.permute.xlu0 %3064 }
 0xe9f   : > { %v4502_v46 = vpack.c.bf16 %v2831_v44, %v2830_v45 }
 0xea0   : > { %v4673_v48 = vpop.eup %4672 }
 0xea1   : > { %4504 = vmatpush3.bf16.xpose.msk.msra.mxu0 %vm4947_vm4, %v4502_v46  ;;  %v2832_v52 = vmul.f32 %v4673_v48, %v4665_v22 }
 0xea2   : > { %4409 = vmatprep.subr.msk.mxu0 %vm411_vm1, %v3065_v47 }
 0xea4   : > { %v4675_v50 = vpop.eup %4674 }
 0xea5   : > { %v2833_v53 = vmul.f32 %v4675_v50, %v4667_v24 }
 0xea7   : > { %v4506_v54 = vpack.c.bf16 %v2833_v53, %v2832_v52 }
 0xea8   : > { %4400 = vmatmul.mubr.msk.f32.vlgmr.msra.gmra.mrb[24].mxu0 %vm237_vm0, %v2835_v32 }
 0xea9   : > { %4508 = vmatpush3.bf16.xpose.msk.msra.mxu1 %vm4947_vm4, %v4506_v54  ;;  %4410 = vmatpush3.msk.msra.mxu0 %vm411_vm1, %v3065_v47 }
 0xeaa   : > { %4414 = vmatprep.subr.msk.mxu1 %vm411_vm1, %v3150_v55  ;;  %4509 = vmatprep.subr.bf16.mxu0 %v4774_v56 }
 0xeb0   : > { %4407 = vmatmul.mubr.msk.f32.vlgmr.msra.gmra.mrb[24].mxu1 %vm237_vm0, %v2915_v34 }
 0xeb1   : > { %4415 = vmatpush3.msk.msra.mxu1 %vm411_vm1, %v3150_v55 }
 0xeb2   : > { %4513 = vmatprep.subr.bf16.mxu1 %v4774_v56 }
 0xec0   : > { %v3016_v58 = vpop.trf.xlu0 }
 0xec1   : > { %4411 = vmatprep.mubr.msk.f32.mxu0 %vm404_vm2, %v3016_v58 }
 0xec2   : > { %v3048_v59 = vpop.trf.xlu1 }
 0xec3   : > { %4416 = vmatprep.mubr.msk.f32.mxu1 %vm404_vm2, %v3048_v59 }
 0xec4   : > { %v3017_v60 = vpop.trf.xlu0 }
 0xec5   : > { %4412 = vmatmul.mubr.msk.f32.vlgmr.msra.gmra.mrb[26].mxu0 %vm404_vm2, %v3017_v60 }
 0xec6   : > { %v3049_v61 = vpop.trf.xlu1  ;;  %4423 = vmatprep.mubr.msk.f32.mxu0 %vm4775_vm3, %v4776_v57 }
 0xec7   : > { %4417 = vmatmul.mubr.msk.f32.vlgmr.msra.gmra.mrb[26].mxu1 %vm404_vm2, %v3049_v61 }
 0xec8   : > { %4430 = vmatprep.mubr.msk.f32.mxu1 %vm4775_vm3, %v4776_v57 }
 0xf7b   : > { %v5199_v62 = vpop.f32.mrb[24].mxu0 }
 0xf7c   : > { %v4401_v63 = vpop.f32.mrb[25].mxu0 }
 0xf83   : > { %v5201_v0 = vpop.f32.mrb[24].mxu1 }
 0xf84   : > { %v4408_v1 = vpop.f32.mrb[25].mxu1 }
 0xf98   : > { %v4413_v2 = vpop.f32.mrb[26].mxu0 }
 0xf99   : > { %v3140_v3 = vpop.f32.mrb[27].mxu0  ;;  %v3237_v4 = vsel %vm237_vm0, %v4413_v2, -inf }
 0xf9a   : > { %3238 = vmax.xlane.f32.xlu1 %v3237_v4  ;;  %v3234_v5 = vsel %vm237_vm0, %v3140_v3, -inf  ;;  %v4418_v7 = vpop.f32.mrb[26].mxu1 }
 0xf9b   : > { %3235 = vmax.xlane.f32.xlu0 %v3234_v5  ;;  %v3225_v8 = vpop.f32.mrb[27].mxu1  ;;  %v3243_v10 = vsel %vm237_vm0, %v4418_v7, -inf }
 0xf9c   : > { %v3240_v9 = vsel %vm237_vm0, %v3225_v8, -inf }
 0xf9f   : > { %3241 = vmax.xlane.f32.xlu0 %v3240_v9 }
 0xfa3   : > { %3244 = vmax.xlane.f32.xlu0 %v3243_v10 }
 0xfab   : > { %3438 = vrot.lane.b32.xlu1 %v4883_v15, %s4782_s19 }
 0xfaf   : > { %3278 = vrot.lane.b32.xlu1 %v4955_v11, %s4781_s17 }
 0xfb3   : > { %3358 = vrot.lane.b32.xlu1 %v4965_v20, %s4781_s17 }
 0xfb9   : > { %3440 = vrot.lane.b32.xlu0 %v4896_v17, %s4782_s19 }
0x1027   : > { %v3239_v12 = vpop.xlane.xlu1 %3238 }
0x1028   : > { %v3247_v14 = vsub.f32 %v4413_v2, %v3239_v12  ;;  %v3236_v18 = vpop.xlane.xlu0 %3235 }
0x1029   : > { %v3246_v19 = vsub.f32 %v3140_v3, %v3236_v18 }
0x102a   : > { %v3252_v21 = vmul.f32 1.442695, %v3247_v14 }
0x102b   : > { %v3250_v22 = vmul.f32 1.442695, %v3246_v19  ;;  %v3439_v43 = vpop.permute.xlu1 %3438 }
0x102c   : > { %4676 = vpow2.f32 %v3252_v21  ;;  %v3242_v23 = vpop.xlane.xlu0 %3241 }
0x102d   : > { %4678 = vpow2.f32 %v3250_v22  ;;  %v3248_v24 = vsub.f32 %v3225_v8, %v3242_v23 }
0x102f   : > { %v3254_v15 = vmul.f32 1.442695, %v3248_v24  ;;  %v3279_v45 = vpop.permute.xlu1 %3278 }
0x1030   : > { %v3245_v26 = vpop.xlane.xlu0 %3244 }
0x1031   : > { %4680 = vpow2.f32 %v3254_v15  ;;  %v3249_v29 = vsub.f32 %v4418_v7, %v3245_v26 }
0x1033   : > { %v3256_v31 = vmul.f32 1.442695, %v3249_v29  ;;  %v3359_v46 = vpop.permute.xlu1 %3358 }
0x1034   : > { %v3441_v44 = vpop.permute.xlu0 %3440 }
0x1035   : > { %4682 = vpow2.f32 %v3256_v31 }
0x1036   : > { %v4677_v32 = vpop.eup %4676 }
0x1037   : > { %v4679_v34 = vpop.eup %4678  ;;  %v3261_v17 = vsel %vm237_vm0, %v4677_v32, 0.0 }
0x1038   : > { %3262 = vadd.xlane.f32.xlu0 %v3261_v17  ;;  %v3258_v36 = vsel %vm237_vm0, %v4679_v34, 0.0 }
0x1039   : > { %3259 = vadd.xlane.f32.xlu1 %v3258_v36 }
0x103b   : > { %v4681_v37 = vpop.eup %4680 }
0x103c   : > { %v3264_v38 = vsel %vm237_vm0, %v4681_v37, 0.0 }
0x103d   : > { %3265 = vadd.xlane.f32.xlu1 %v3264_v38 }
0x103f   : > { %v4683_v39 = vpop.eup %4682 }
0x1040   : > { %v3267_v41 = vsel %vm237_vm0, %v4683_v39, 0.0 }
0x1041   : > { %3268 = vadd.xlane.f32.xlu0 %v3267_v41 }
0x104e   : > { %3593 = vrot.lane.b32.xlu1 %v4888_v16, %s4782_s19 }
0x1057   : > { %3508 = vrot.lane.b32.xlu0 %v4881_v13, %s4782_s19 }
0x1075   : > { %3444 = vxpose.xlu0.b32.start.end [1/1] (short) (narrow) %v3439_v43, 16 }
0x1077   : > { %3476 = vxpose.xlu1.b32.start.end [1/1] (short) (narrow) %v3441_v44, 16 }
0x10c5   : > { %v3263_v47 = vpop.xlane.xlu0 %3262 }
0x10c6   : > { %4684 = vrcp.f32 %v3263_v47  ;;  %v3260_v48 = vpop.xlane.xlu1 %3259 }
0x10c7   : > { %4686 = vrcp.f32 %v3260_v48 }
0x10ca   : > { %v3266_v50 = vpop.xlane.xlu1 %3265 }
0x10cb   : > { %4688 = vrcp.f32 %v3266_v50 }
0x10ce   : > { %v3269_v52 = vpop.xlane.xlu0 %3268  ;;  %v3594_v2 = vpop.permute.xlu1 %3593 }
0x10cf   : > { %4690 = vrcp.f32 %v3269_v52 }
0x10d0   : > { %v4685_v53 = vpop.eup %4684 }
0x10d1   : > { %v4687_v54 = vpop.eup %4686  ;;  %v3275_v16 = vmul.f32 %v4685_v53, %v4677_v32 }
0x10d2   : > { %v3274_v55 = vmul.f32 %v4687_v54, %v4679_v34  ;;  %v3509_v13 = vpop.permute.xlu0 %3508 }
0x10d4   : > { %v4510_v58 = vpack.c.bf16 %v3275_v16, %v3274_v55 }
0x10d5   : > { %v4689_v59 = vpop.eup %4688 }
0x10d6   : > { %4512 = vmatpush3.bf16.xpose.msk.msra.mxu0 %vm4947_vm4, %v4510_v58  ;;  %v3276_v61 = vmul.f32 %v4689_v59, %v4681_v37 }
0x10d7   : > { %4433 = vmatprep.subr.msk.mxu0 %vm411_vm1, %v3509_v13 }
0x10d9   : > { %v4691_v60 = vpop.eup %4690 }
0x10da   : > { %v3277_v63 = vmul.f32 %v4691_v60, %v4683_v39 }
0x10dc   : > { %v4514_v1 = vpack.c.bf16 %v3277_v63, %v3276_v61 }
0x10dd   : > { %4424 = vmatmul.mubr.msk.f32.vlgmr.msra.gmra.mrb[28].mxu0 %vm237_vm0, %v3279_v45 }
0x10de   : > { %4516 = vmatpush3.bf16.xpose.msk.msra.mxu1 %vm4947_vm4, %v4514_v1  ;;  %4434 = vmatpush3.msk.msra.mxu0 %vm411_vm1, %v3509_v13 }
0x10df   : > { %4438 = vmatprep.subr.msk.mxu1 %vm411_vm1, %v3594_v2  ;;  %4517 = vmatprep.subr.bf16.mxu0 %v4774_v56 }
0x10e5   : > { %4431 = vmatmul.mubr.msk.f32.vlgmr.msra.gmra.mrb[28].mxu1 %vm237_vm0, %v3359_v46 }
0x10e6   : > { %4439 = vmatpush3.msk.msra.mxu1 %vm411_vm1, %v3594_v2 }
0x10e7   : > { %4521 = vmatprep.subr.bf16.mxu1 %v4774_v56 }
0x10f5   : > { %v3460_v3 = vpop.trf.xlu0 }
0x10f6   : > { %4435 = vmatprep.mubr.msk.f32.mxu0 %vm404_vm2, %v3460_v3 }
0x10f7   : > { %v3492_v4 = vpop.trf.xlu1 }
0x10f8   : > { %4440 = vmatprep.mubr.msk.f32.mxu1 %vm404_vm2, %v3492_v4 }
0x10f9   : > { %v3461_v5 = vpop.trf.xlu0 }
0x10fa   : > { %4436 = vmatmul.mubr.msk.f32.vlgmr.msra.gmra.mrb[30].mxu0 %vm404_vm2, %v3461_v5 }
0x10fb   : > { %v3493_v7 = vpop.trf.xlu1  ;;  %4447 = vmatprep.mubr.msk.f32.mxu0 %vm4775_vm3, %v4776_v57 }
0x10fc   : > { %4441 = vmatmul.mubr.msk.f32.vlgmr.msra.gmra.mrb[30].mxu1 %vm404_vm2, %v3493_v7 }
0x10fd   : > { %4454 = vmatprep.mubr.msk.f32.mxu1 %vm4775_vm3, %v4776_v57 }
0x11b0   : > { %v3354_v8 = vpop.f32.mrb[28].mxu0 }
0x11b1   : > { %v4425_v56 = vpop.f32.mrb[29].mxu0 }
0x11b8   : > { %v3434_v9 = vpop.f32.mrb[28].mxu1 }
0x11b9   : > { %v4432_v10 = vpop.f32.mrb[29].mxu1 }
0x11cd   : > { %v4437_v12 = vpop.f32.mrb[30].mxu0 }
0x11ce   : > { %v3584_v14 = vpop.f32.mrb[31].mxu0  ;;  %v3681_v18 = vsel %vm237_vm0, %v4437_v12, -inf }
0x11cf   : > { %3682 = vmax.xlane.f32.xlu1 %v3681_v18  ;;  %v3678_v19 = vsel %vm237_vm0, %v3584_v14, -inf  ;;  %v4442_v21 = vpop.f32.mrb[30].mxu1 }
0x11d0   : > { %3679 = vmax.xlane.f32.xlu0 %v3678_v19  ;;  %v3669_v22 = vpop.f32.mrb[31].mxu1  ;;  %v3687_v24 = vsel %vm237_vm0, %v4442_v21, -inf }
0x11d1   : > { %v3684_v23 = vsel %vm237_vm0, %v3669_v22, -inf }
0x11d4   : > { %3685 = vmax.xlane.f32.xlu0 %v3684_v23 }
0x11d8   : > { %3688 = vmax.xlane.f32.xlu0 %v3687_v24 }
0x125c   : > { %v3683_v57 = vpop.xlane.xlu1 %3682 }
0x125d   : > { %v3691_v15 = vsub.f32 %v4437_v12, %v3683_v57  ;;  %v3680_v26 = vpop.xlane.xlu0 %3679 }
0x125e   : > { %v3690_v29 = vsub.f32 %v3584_v14, %v3680_v26 }
0x125f   : > { %v3696_v31 = vmul.f32 1.442695, %v3691_v15 }
0x1260   : > { %v3694_v32 = vmul.f32 1.442695, %v3690_v29 }
0x1261   : > { %4692 = vpow2.f32 %v3696_v31  ;;  %v3686_v34 = vpop.xlane.xlu0 %3685 }
0x1262   : > { %4694 = vpow2.f32 %v3694_v32  ;;  %v3692_v17 = vsub.f32 %v3669_v22, %v3686_v34 }
0x1264   : > { %v3698_v36 = vmul.f32 1.442695, %v3692_v17 }
0x1265   : > { %v3689_v37 = vpop.xlane.xlu0 %3688 }
0x1266   : > { %4696 = vpow2.f32 %v3698_v36  ;;  %v3693_v38 = vsub.f32 %v4442_v21, %v3689_v37 }
0x1268   : > { %v3700_v39 = vmul.f32 1.442695, %v3693_v38 }
0x126a   : > { %4698 = vpow2.f32 %v3700_v39 }
0x126b   : > { %v4693_v41 = vpop.eup %4692 }
0x126c   : > { %v4695_v43 = vpop.eup %4694  ;;  %v3705_v44 = vsel %vm237_vm0, %v4693_v41, 0.0 }
0x126d   : > { %3706 = vadd.xlane.f32.xlu0 %v3705_v44  ;;  %v3702_v45 = vsel %vm237_vm0, %v4695_v43, 0.0 }
0x126e   : > { %3703 = vadd.xlane.f32.xlu1 %v3702_v45 }
0x1270   : > { %v4697_v46 = vpop.eup %4696 }
0x1271   : > { %v3708_v47 = vsel %vm237_vm0, %v4697_v46, 0.0 }
0x1272   : > { %3709 = vadd.xlane.f32.xlu1 %v3708_v47 }
0x1274   : > { %v4699_v48 = vpop.eup %4698 }
0x1275   : > { %v3711_v50 = vsel %vm237_vm0, %v4699_v48, 0.0 }
0x1276   : > { %3712 = vadd.xlane.f32.xlu0 %v3711_v50 }
0x1283   : > { %3722 = vrot.lane.b32.xlu1 %v4955_v11, %s4782_s19 }
0x1287   : > { %3884 = vrot.lane.b32.xlu1 %v5023_v28, %s4782_s19 }
0x128b   : > { %3886 = vrot.lane.b32.xlu1 %v5025_v30, %s4782_s19 }
0x128c   : > { %3802 = vrot.lane.b32.xlu0 %v4965_v20, %s4782_s19 }
0x128f   : > { %3894 = vrot.lane.b32.xlu1 %v5069_v35, %s4781_s17 }
0x1290   : > { %3892 = vrot.lane.b32.xlu0 %v5067_v33, %s4781_s17 }
0x1293   : > { %3902 = vrot.lane.b32.xlu1 %v5113_v42, %s4780_s11 }
0x1294   : > { %3900 = vrot.lane.b32.xlu0 %v5111_v40, %s4780_s11 }
0x1297   : > { %3910 = vrot.lane.b32.xlu1 %v5157_v51, %s4779_s10 }
0x1298   : > { %3908 = vrot.lane.b32.xlu0 %v5155_v49, %s4779_s10 }
0x129b   : > { %3918 = vrot.lane.b32.xlu1 %v5201_v0, %s4778_s8 }
0x129c   : > { %3916 = vrot.lane.b32.xlu0 %v5199_v62, %s4778_s8 }
0x129f   : > { %3926 = vrot.lane.b32.xlu1 %v3434_v9, %s4777_s7 }
0x12a0   : > { %3924 = vrot.lane.b32.xlu0 %v3354_v8, %s4777_s7 }
0x12fa   : > { %v3707_v11 = vpop.xlane.xlu0 %3706 }
0x12fb   : > { %4700 = vrcp.f32 %v3707_v11  ;;  %v3704_v20 = vpop.xlane.xlu1 %3703 }
0x12fc   : > { %4702 = vrcp.f32 %v3704_v20 }
0x12ff   : > { %v3710_v28 = vpop.xlane.xlu1 %3709 }
0x1300   : > { %4704 = vrcp.f32 %v3710_v28 }
0x1303   : > { %v3713_v30 = vpop.xlane.xlu0 %3712  ;;  %v3723_v53 = vpop.permute.xlu1 %3722 }
0x1304   : > { %4706 = vrcp.f32 %v3713_v30 }
0x1305   : > { %v4701_v33 = vpop.eup %4700 }
0x1306   : > { %v4703_v35 = vpop.eup %4702  ;;  %v3719_v40 = vmul.f32 %v4701_v33, %v4693_v41 }
0x1307   : > { %v3718_v42 = vmul.f32 %v4703_v35, %v4695_v43  ;;  %v3803_v16 = vpop.permute.xlu0 %3802  ;;  %v3885_v60 = vpop.permute.xlu1 %3884 }
0x1308   : > { %v3938_v7 = vsel %vm237_vm0, %v4979_v25, %v3885_v60 }
0x1309   : > { %v4518_v49 = vpack.c.bf16 %v3719_v40, %v3718_v42 }
0x130a   : > { %v4705_v51 = vpop.eup %4704 }
0x130b   : > { %4520 = vmatpush3.bf16.xpose.msk.msra.mxu0 %vm4947_vm4, %v4518_v49  ;;  %v3720_v0 = vmul.f32 %v4705_v51, %v4697_v46  ;;  %v3893_v61 = vpop.permute.xlu0 %3892  ;;  %v3887_v63 = vpop.permute.xlu1 %3886 }
0x130c   : > { %v3941_v8 = vsel %vm3940_vm5, %v3938_v7, %v3893_v61  ;;  %v3939_v21 = vsel %vm237_vm0, %v4981_v27, %v3887_v63 }
0x130e   : > { %v4707_v62 = vpop.eup %4706 }
0x130f   : > { %v3721_v52 = vmul.f32 %v4707_v62, %v4699_v48  ;;  %v3901_v1 = vpop.permute.xlu0 %3900  ;;  %v3895_v2 = vpop.permute.xlu1 %3894 }
0x1310   : > { %v3944_v9 = vsel %vm3943_vm6, %v3941_v8, %v3901_v1  ;;  %v3942_v22 = vsel %vm3940_vm5, %v3939_v21, %v3895_v2 }
0x1311   : > { %v4522_v54 = vpack.c.bf16 %v3721_v52, %v3720_v0 }
0x1312   : > { %4448 = vmatmul.mubr.msk.f32.vlgmr.msra.gmra.mrb[32].mxu0 %vm237_vm0, %v3723_v53 }
0x1313   : > { %4524 = vmatpush3.bf16.xpose.msk.msra.mxu1 %vm4947_vm4, %v4522_v54  ;;  %v3909_v3 = vpop.permute.xlu0 %3908  ;;  %v3903_v4 = vpop.permute.xlu1 %3902 }
0x1314   : > { %v3947_v10 = vsel %vm3946_vm7, %v3944_v9, %v3909_v3  ;;  %v3945_v24 = vsel %vm3943_vm6, %v3942_v22, %v3903_v4 }
0x1317   : > { %v3917_v6 = vpop.permute.xlu0 %3916  ;;  %v3911_v5 = vpop.permute.xlu1 %3910 }
0x1318   : > { %v3950_v14 = vsel %vm3949_vm8, %v3947_v10, %v3917_v6  ;;  %v3948_v57 = vsel %vm3946_vm7, %v3945_v24, %v3911_v5 }
0x131a   : > { %4455 = vmatmul.mubr.msk.f32.vlgmr.msra.gmra.mrb[32].mxu1 %vm237_vm0, %v3803_v16 }
0x131b   : > { %v3925_v56 = vpop.permute.xlu0 %3924  ;;  %v3919_v12 = vpop.permute.xlu1 %3918 }
0x131c   : > { %v3953_v18 = vsel %vm3952_vm9, %v3950_v14, %v3925_v56  ;;  %v3951_v15 = vsel %vm3949_vm8, %v3948_v57, %v3919_v12 }
0x131f   : > { %v3927_v23 = vpop.permute.xlu1 %3926 }
0x1320   : > { %v3954_v27 = vsel %vm3952_vm9, %v3951_v15, %v3927_v23 }
0x13e5   : > { %v3798_v55 = vpop.f32.mrb[32].mxu0 }
0x13e6   : > { %3932 = vrot.lane.b32.xlu0 %v3798_v55, %s4773_s28  ;;  %v4449_v58 = vpop.f32.mrb[33].mxu0 }
0x13ed   : > { %v3878_v13 = vpop.f32.mrb[32].mxu1 }
0x13ee   : > { %3934 = vrot.lane.b32.xlu1 %v3878_v13, %s4773_s28  ;;  %v4456_v59 = vpop.f32.mrb[33].mxu1  ;;  %s4708_s28 = scalar_lea.vmem %s5301_s24, 256 }
0x13ef   : > { %p4709_p13 = scmp.ne.s32.totalorder %s5301_s24, %s4708_s28  ;;  %p4716_p3 = scmp.lt.s32.totalorder %s4714_s5, %s4708_s28 }
0x13f1   : > { %p4710_p0 = pnand %p4709_p13, %p4845_p6  ;;  %p4717_p4 = por %p4716_p3, %p4715_p2 }
0x13f3   : > { %p4711_p1 = pneg %p4710_p0 }
0x13f5   : > { %p4718_p5 = pnand %p4717_p4, %p4711_p1 }
0x1458   : > { %v3933_v19 = vpop.permute.xlu0 %3932 }
0x1459   : > { %v3956_v25 = vsel %vm3955_vm10, %v3953_v18, %v3933_v19 }
0x145a   : > { %3958 = vst [vmem:[%s206_s20] sm:$0xff] %v3956_v25 }
0x1460   : > { %v3935_v26 = vpop.permute.xlu1 %3934 }
0x1461   : > { %v3957_v29 = vsel %vm3955_vm10, %v3954_v27, %v3935_v26 }
0x1462   : > { %3959 = vst [vmem:[%s206_s20 + $0x8] sm:$0xff] %v3957_v29 }
0x1463   : > { %4721 = shalt.err (!%p4718_p5)
}
0x1464   : > { %s4722_s4 = scalar_lea.hbm %s5307_s27, 256  ;;  %s4726_s8 = scalar_lea.hbm %s5357_s3, 1024 }
0x1465   : > { %p4723_p7 = scmp.ne.s32.totalorder %s5307_s27, %s4722_s4  ;;  %p4727_p11 = scmp.lt.u32.totalorder %s5307_s27, %s5357_s3 }
0x1466   : > { %p4728_p12 = scmp.lt.u32.totalorder %s4726_s8, %s4722_s4  ;;  %p4730_p0 = scmp.lt.u32.totalorder %s4722_s4, %s5307_s27 }
0x1467   : > { %p4724_p9 = pnand %p4723_p7, %p4845_p6 }
0x1468   : > { %p4729_p13 = por %p4728_p12, %p4727_p11 }
0x1469   : > { %p4725_p10 = pneg %p4724_p9 }
0x146a   : > { %p4731_p1 = por %p4730_p0, %p4729_p13 }
0x146c   : > { %p4732_p2 = pnand %p4731_p1, %p4725_p10 }
0x146e   : > { %4735 = shalt.err (!%p4732_p2)
}
0x146f   : > { %s4784_s17 = smov 128   ;;  %s4785_s19 = smov 512  }
0x1470   : > { %s4786_s20 = smov 8  }
0x1471   : > { %4525 = dma.vmem_to_hbm [thread:$0]  (%p4845_p6), %s5301_s24, 256, %s5307_s27, %s5313_s16, %s4784_s17, %s4785_s19, %s4786_s20  }
0x1472 PF: > { %p4531_p3 = scmp.ge.s32.totalorder %s4770_s15, 2  ;;  %s3988_s25 = sand.u32 1, %s4758_s12  }
0x1473   : > { %s3989_s9 = scalar_lea.sflag [#allocation4], %s3988_s25 }
0x1474   : > { %p4528_p4 = pnand %p4531_p3, %p4849_p8 }
0x1476   : > { %4753 = dma.done.wait (!%p4528_p4), %s3989_s9, 256  }
0x1477   : > { %4755 = vsyncadd (!%p4528_p4), %s3989_s9, 4294967040  ;;  %p13_p5 = scmp.ge.s32.totalorder %s4830_s18, 6   ;;  %s5362_s12 = smov %s4762_s13 }
0x1478   : > { %s5363_s13 = smov %s4766_s14  ;;  %s5364_s14 = smov %s4843_s21 }
0x1479   : > { %s5365_s15 = smov %s4830_s18  ;;  %15 = sbr.rel (!%p13_p5) target bundleno = 3 (0x3), region = 110 }
0x1480   :  { %3994 = vsyncpa [#allocation4], 1 }
0x1481   :  { %3996 = vsyncpa [#allocation4 + $0x1], 1 }

</bundles_post_ra>
